<compile_context>
chip_gen: v5e
topology: v5e:2x2
jax: 0.10.0
libtpu: 0.0.40
codegen_flags: <defaults>
</compile_context>

<pallas_src>
import numpy as np
import jax
import jax.numpy as jnp
from jax.experimental import pallas as pl
from jax.experimental.pallas import tpu as pltpu

# ----------------------------- constants (match the PyTorch module) ----------
ALPHA = 0.9
GAMMA = 2.2
WIN_SIZE = 11          # pytorch_msssim default
WIN_SIGMA = 1.5        # pytorch_msssim default
DATA_RANGE = 1.0
K1, K2 = 0.01, 0.03
C1 = (K1 * DATA_RANGE) ** 2
C2 = (K2 * DATA_RANGE) ** 2

_LANE = 128
_SUBLANE = 8


# ----------------------------- host-side helpers ------------------------------
def _round_up(x, m):
    return ((x + m - 1) // m) * m


def _gaussian_1d(size, sigma):
    coords = np.arange(size, dtype=np.float64) - size // 2
    g = np.exp(-(coords ** 2) / (2.0 * sigma ** 2))
    return (g / g.sum()).astype(np.float32)


def _valid_conv_matrix(n_in, n_out_padded, win):
    """M[i, j] = win[i - j]; 'valid' cross-correlation as x @ M (zero-padded cols)."""
    k = win.shape[0]
    n_out = n_in - k + 1
    m = np.zeros((n_in, n_out_padded), dtype=np.float32)
    for j in range(n_out):
        m[j:j + k, j] = win
    return m


def _block_diag_height_filter(bt, H, houtp, win):
    """(bt*houtp, bt*H) block-diagonal 'valid' height filter: one (houtp, H)
    block per image of the batch tile, so the height pass over the whole tile
    is a single 2-D matmul per map (large M, filter resident in VMEM)."""
    fht = _valid_conv_matrix(H, houtp, win).T          # (houtp, H)
    blk = np.zeros((bt * houtp, bt * H), dtype=np.float32)
    for b in range(bt):
        blk[b * houtp:(b + 1) * houtp, b * H:(b + 1) * H] = fht
    return blk


def _vmem_capacity_bytes():
    try:
        return int(pltpu.get_tpu_info().vmem_capacity_bytes)
    except Exception:
        return 64 * 1024 * 1024        # conservative (v7x per-TensorCore VMEM)


def _estimate_block_vmem(bt, H, W, houtp, woutp):
    """Per-grid-step VMEM working set (f32), including (8,128) tile padding of
    narrow last dims — a (bt*H, 16) block really occupies bt*H*128 lanes."""
    wp = _round_up(W, _LANE)
    rows = bt * H
    in_bytes = 2 * 2 * rows * wp * 4                 # pred/target, double-buffered
    ew_bytes = 4 * rows * wp * 4                     # x, y, diff / product temps
    wpass = 2 * rows * woutp * 4                     # transient width-filtered maps
    maps = 5 * bt * houtp * woutp * 4                # mu1, mu2, ex2, ey2, exy
    ssim_tmp = 4 * bt * houtp * woutp * 4            # s1/s2/s12/cs/lum (reused)
    fw_b = 2 * _round_up(W, _SUBLANE) * woutp * 4    # resident width filter (2 bufs)
    fh_b = 2 * bt * houtp * _round_up(bt * H, _LANE) * 4   # block-diag height filter
    return int(1.3 * (in_bytes + ew_bytes + wpass + maps + ssim_tmp + fw_b + fh_b))


def _choose_block_batch(B, H, W, houtp, woutp, budget_bytes):
    """Largest batch-tile (divisor of B, capped so the block-diag height filter
    stays small) that fits the budget; prefer an EVEN number of grid steps >= 2
    so the 'parallel' axis shards cleanly across v7x's two TensorCores."""
    cands = [d for d in range(1, B + 1)
             if B % d == 0 and d <= 16
             and ((d * H) % _SUBLANE == 0 or d == B)]
    if not cands:
        cands = [B]
    fitting = [d for d in cands
               if _estimate_block_vmem(d, H, W, houtp, woutp) <= budget_bytes]
    if not fitting:
        fitting = [min(cands)]
    even = [d for d in fitting if (B // d) >= 2 and (B // d) % 2 == 0]
    multi = [d for d in fitting if (B // d) >= 2]
    pool = even or multi or fitting
    return max(pool)


# ----------------------------- Pallas kernel ----------------------------------
def _make_kernel(Bt, H, W, Houtp, Woutp):
    def _pow_pos(x, p):
        # x ** p for x >= 0 (0 -> 0); matches torch.pow on nonnegative inputs.
        return jnp.exp(jnp.float32(p) * jnp.log(x))

    def _aces_gamma(x):
        lin = _pow_pos(x, GAMMA)
        num = lin * (2.51 * lin + 0.03)
        den = lin * (2.43 * lin + 0.59) + 0.14
        a = jnp.clip(num / den, 0.0, 1.0)
        return _pow_pos(a, 1.0 / GAMMA)

    def kernel(p_ref, t_ref, fw_ref, fhb_ref, sq_ref, ss_ref):
        p = p_ref[...]                        # (Bt*H, W)
        t = t_ref[...]

        # ---- MSE partial sum on the raw inputs (VPU) ----
        diff = p - t
        sum_sq = jnp.sum(diff * diff)

        # ---- ACES tone-map + gamma (EUP/VPU) ----
        x = _aces_gamma(p)
        y = _aces_gamma(t)

        fw = fw_ref[...]                      # (W, Woutp)         resident
        fhb = fhb_ref[...]                    # (Bt*Houtp, Bt*H)   resident

        def gfilt(m):
            # Separable 11-tap Gaussian, "valid": one lane-dense width matmul
            # and one block-diagonal height matmul over the whole batch tile.
            mw = jnp.dot(m, fw, preferred_element_type=jnp.float32)      # (Bt*H, Woutp)
            return jnp.dot(fhb, mw, preferred_element_type=jnp.float32)  # (Bt*Houtp, Woutp)

        mu1 = gfilt(x)
        mu2 = gfilt(y)
        ex2 = gfilt(x * x)
        ey2 = gfilt(y * y)
        exy = gfilt(x * y)

        s1 = ex2 - mu1 * mu1
        s2 = ey2 - mu2 * mu2
        s12 = exy - mu1 * mu2

        cs = (2.0 * s12 + C2) / (s1 + s2 + C2)
        lum = (2.0 * mu1 * mu2 + C1) / (mu1 * mu1 + mu2 * mu2 + C1)
        # Padded rows/cols of the filtered maps are exactly zero (zero filter
        # rows/cols), so ssim_map there is 1.0 — corrected host-side, no mask.
        ssim_map = lum * cs                   # (Bt*Houtp, Woutp)
        sum_ssim = jnp.sum(ssim_map)

        # ---- per-block partial sums (one clean (8,128) tile each) ----
        sq_ref[...] = jnp.zeros((1, _SUBLANE, _LANE), jnp.float32) + sum_sq
        ss_ref[...] = jnp.zeros((1, _SUBLANE, _LANE), jnp.float32) + sum_ssim

    return kernel


# ----------------------------- wrapper -----------------------------------------
def mse_loss_with_ssim(pred, target):
    """pred, target: (N, C, H, W) float32.  Returns a scalar float32 loss."""
    N, Ch, H, W = pred.shape
    B = N * Ch
    hout = H - WIN_SIZE + 1
    wout = W - WIN_SIZE + 1
    assert hout > 0 and wout > 0, "spatial dims must exceed the 11-tap window"

    houtp = _round_up(hout, _SUBLANE)   # sublane dim of the filtered maps
    woutp = _round_up(wout, _LANE)      # lane dim of the filtered maps

    # Generation-aware VMEM budgets (v5e/v6e: 128 MiB, v7x: 64 MiB per core).
    vmem_cap = _vmem_capacity_bytes()
    vmem_limit = min(int(vmem_cap * 0.85), vmem_cap - 8 * 1024 * 1024)
    block_budget = int(vmem_cap * 0.45)

    bt = _choose_block_batch(B, H, W, houtp, woutp, block_budget)
    nb = B // bt

    win = _gaussian_1d(WIN_SIZE, WIN_SIGMA)
    fw = jnp.asarray(_valid_conv_matrix(W, woutp, win))               # (W, Woutp)
    fhb = jnp.asarray(_block_diag_height_filter(bt, H, houtp, win))   # (bt*Houtp, bt*H)

    p2 = jnp.asarray(pred, jnp.float32).reshape(B * H, W)
    t2 = jnp.asarray(target, jnp.float32).reshape(B * H, W)

    kernel = _make_kernel(bt, H, W, houtp, woutp)

    cost = pl.CostEstimate(
        flops=int(2 * 5 * B * H * W * woutp            # width-pass matmuls
                  + 2 * 5 * B * bt * houtp * H * woutp  # block-diag height matmuls
                  + 40 * B * H * W),                    # elementwise ACES/MSE/SSIM
        transcendentals=int(8 * B * H * W),             # 2 log + 2 exp / pixel / input
        bytes_accessed=int(2 * B * H * W * 4
                           + (W * woutp + bt * houtp * bt * H) * 4
                           + 2 * nb * _SUBLANE * _LANE * 4),
    )

    part_sq, part_ss = pl.pallas_call(
        kernel,
        out_shape=(jax.ShapeDtypeStruct((nb, _SUBLANE, _LANE), jnp.float32),
                   jax.ShapeDtypeStruct((nb, _SUBLANE, _LANE), jnp.float32)),
        grid=(nb,),
        in_specs=[
            pl.BlockSpec((bt * H, W), lambda i: (i, 0)),
            pl.BlockSpec((bt * H, W), lambda i: (i, 0)),
            pl.BlockSpec((W, woutp), lambda i: (0, 0)),            # resident filter
            pl.BlockSpec((bt * houtp, bt * H), lambda i: (0, 0)),  # resident filter
        ],
        out_specs=(
            pl.BlockSpec((1, _SUBLANE, _LANE), lambda i: (i, 0, 0)),
            pl.BlockSpec((1, _SUBLANE, _LANE), lambda i: (i, 0, 0)),
        ),
        compiler_params=pltpu.CompilerParams(
            dimension_semantics=("parallel",),     # 2 TCs on v7x, pipelined elsewhere
            vmem_limit_bytes=vmem_limit,
        ),
        cost_estimate=cost,
    )(p2, t2, fw, fhb)

    # Finalize with GLOBAL counts; subtract the (exactly-1.0) padded SSIM entries.
    mse = jnp.sum(part_sq[:, 0, 0]) / jnp.float32(B * H * W)
    n_pad = B * (houtp * woutp - hout * wout)
    ssim_val = (jnp.sum(part_ss[:, 0, 0]) - jnp.float32(n_pad)) / jnp.float32(B * hout * wout)
    return ALPHA * mse + (1.0 - ALPHA) * (1.0 - ssim_val)


# ----------------------------- pure-JAX reference -------------------------------
def _reference(pred, target):
    N, Ch, H, W = pred.shape
    B = N * Ch
    hout = H - WIN_SIZE + 1
    wout = W - WIN_SIZE + 1
    win = _gaussian_1d(WIN_SIZE, WIN_SIGMA)
    fw = jnp.asarray(_valid_conv_matrix(W, wout, win))
    fh = jnp.asarray(_valid_conv_matrix(H, hout, win))
    p3 = jnp.asarray(pred, jnp.float32).reshape(B, H, W)
    t3 = jnp.asarray(target, jnp.float32).reshape(B, H, W)

    def aces_gamma(x):
        lin = x ** GAMMA
        num = lin * (2.51 * lin + 0.03)
        den = lin * (2.43 * lin + 0.59) + 0.14
        a = jnp.clip(num / den, 0.0, 1.0)
        return a ** (1.0 / GAMMA)

    mse = jnp.mean((p3 - t3) ** 2)
    x = aces_gamma(p3)
    y = aces_gamma(t3)

    def gfilt(z):
        zw = jnp.einsum('bhw,wk->bhk', z, fw)
        return jnp.einsum('jh,bhk->bjk', fh.T, zw)

    mu1, mu2 = gfilt(x), gfilt(y)
    s1 = gfilt(x * x) - mu1 * mu1
    s2 = gfilt(y * y) - mu2 * mu2
    s12 = gfilt(x * y) - mu1 * mu2
    cs = (2 * s12 + C2) / (s1 + s2 + C2)
    ssim_map = ((2 * mu1 * mu2 + C1) / (mu1 * mu1 + mu2 * mu2 + C1)) * cs
    return ALPHA * mse + (1.0 - ALPHA) * (1.0 - jnp.mean(ssim_map))


# ----------------------------- demo ---------------------------------------------
if __name__ == "__main__":
    key = jax.random.PRNGKey(0)
    k1, k2 = jax.random.split(key)
    N, Ch, H, W = 2, 4, 16, 16
    pred = jax.random.uniform(k1, (N, Ch, H, W), dtype=jnp.float32)
    target = jax.random.uniform(k2, (N, Ch, H, W), dtype=jnp.float32)

    loss = mse_loss_with_ssim(pred, target)
    jax.block_until_ready(loss)

    ref = _reference(pred, target)
    assert jnp.allclose(loss, ref, rtol=1e-3, atol=1e-4), (loss, ref)

    print("KERNEL_OK")
</pallas_src>

<mosaic_0001>
module attributes {stable_mosaic.version = 11 : i64} {
  func.func @kernel(%arg0: i32, %arg1: memref<64x16xf32, #tpu.memory_space<vmem>>, %arg2: memref<64x16xf32, #tpu.memory_space<vmem>>, %arg3: memref<16x128xf32, #tpu.memory_space<vmem>>, %arg4: memref<32x64xf32, #tpu.memory_space<vmem>>, %arg5: memref<1x8x128xf32, #tpu.memory_space<vmem>>, %arg6: memref<1x8x128xf32, #tpu.memory_space<vmem>>) attributes {dimension_semantics = [#tpu.dimension_semantics<parallel>], iteration_bounds = array<i64: 2>, scalar_prefetch = 0 : i64, scratch_operands = 0 : i64, tpu.core_type = #tpu.core_type<tc>, window_params = [{transform_indices = @transform_0, window_bounds = array<i64: 64, 16>}, {transform_indices = @transform_1, window_bounds = array<i64: 64, 16>}, {pipeline_mode = #tpu.pipeline_mode<synchronous>, transform_indices = @transform_2, window_bounds = array<i64: 16, 128>}, {pipeline_mode = #tpu.pipeline_mode<synchronous>, transform_indices = @transform_3, window_bounds = array<i64: 32, 64>}, {transform_indices = @transform_4, window_bounds = array<i64: 1, 8, 128>}, {transform_indices = @transform_5, window_bounds = array<i64: 1, 8, 128>}]} {
    %c0 = arith.constant 0 : index
    %c0_0 = arith.constant 0 : index
    %0 = vector.load %arg1[%c0, %c0_0] : memref<64x16xf32, #tpu.memory_space<vmem>>, vector<64x16xf32>
    %c0_1 = arith.constant 0 : index
    %c0_2 = arith.constant 0 : index
    %1 = vector.load %arg2[%c0_1, %c0_2] : memref<64x16xf32, #tpu.memory_space<vmem>>, vector<64x16xf32>
    %2 = arith.subf %0, %1 : vector<64x16xf32>
    %3 = arith.mulf %2, %2 : vector<64x16xf32>
    %4 = vector.shape_cast %3 : vector<64x16xf32> to vector<1x64x16xf32>
    %cst = arith.constant dense<0.000000e+00> : vector<1xf32>
    %5 = vector.multi_reduction <add>, %4, %cst [1, 2] : vector<1x64x16xf32> to vector<1xf32>
    %6 = vector.shape_cast %5 : vector<1xf32> to vector<1x1x1xf32>
    %7 = vector.extract %6[0, 0, 0] : f32 from vector<1x1x1xf32>
    %8 = math.log %0 : vector<64x16xf32>
    %cst_3 = arith.constant 2.200000e+00 : f32
    %9 = vector.broadcast %cst_3 : f32 to vector<64x16xf32>
    %10 = arith.mulf %9, %8 : vector<64x16xf32>
    %11 = math.exp %10 : vector<64x16xf32>
    %cst_4 = arith.constant 2.510000e+00 : f32
    %12 = vector.broadcast %cst_4 : f32 to vector<64x16xf32>
    %13 = arith.mulf %12, %11 : vector<64x16xf32>
    %cst_5 = arith.constant 3.000000e-02 : f32
    %14 = vector.broadcast %cst_5 : f32 to vector<64x16xf32>
    %15 = arith.addf %13, %14 : vector<64x16xf32>
    %16 = arith.mulf %11, %15 : vector<64x16xf32>
    %cst_6 = arith.constant 2.430000e+00 : f32
    %17 = vector.broadcast %cst_6 : f32 to vector<64x16xf32>
    %18 = arith.mulf %17, %11 : vector<64x16xf32>
    %cst_7 = arith.constant 5.900000e-01 : f32
    %19 = vector.broadcast %cst_7 : f32 to vector<64x16xf32>
    %20 = arith.addf %18, %19 : vector<64x16xf32>
    %21 = arith.mulf %11, %20 : vector<64x16xf32>
    %cst_8 = arith.constant 1.400000e-01 : f32
    %22 = vector.broadcast %cst_8 : f32 to vector<64x16xf32>
    %23 = arith.addf %21, %22 : vector<64x16xf32>
    %24 = arith.divf %16, %23 : vector<64x16xf32>
    %cst_9 = arith.constant 0.000000e+00 : f32
    %cst_10 = arith.constant 1.000000e+00 : f32
    %25 = vector.broadcast %cst_9 : f32 to vector<64x16xf32>
    %26 = arith.maximumf %25, %24 : vector<64x16xf32>
    %27 = vector.broadcast %cst_10 : f32 to vector<64x16xf32>
    %28 = arith.minimumf %27, %26 : vector<64x16xf32>
    %29 = math.log %28 : vector<64x16xf32>
    %cst_11 = arith.constant 0.454545468 : f32
    %30 = vector.broadcast %cst_11 : f32 to vector<64x16xf32>
    %31 = arith.mulf %30, %29 : vector<64x16xf32>
    %32 = math.exp %31 : vector<64x16xf32>
    %33 = math.log %1 : vector<64x16xf32>
    %cst_12 = arith.constant 2.200000e+00 : f32
    %34 = vector.broadcast %cst_12 : f32 to vector<64x16xf32>
    %35 = arith.mulf %34, %33 : vector<64x16xf32>
    %36 = math.exp %35 : vector<64x16xf32>
    %cst_13 = arith.constant 2.510000e+00 : f32
    %37 = vector.broadcast %cst_13 : f32 to vector<64x16xf32>
    %38 = arith.mulf %37, %36 : vector<64x16xf32>
    %cst_14 = arith.constant 3.000000e-02 : f32
    %39 = vector.broadcast %cst_14 : f32 to vector<64x16xf32>
    %40 = arith.addf %38, %39 : vector<64x16xf32>
    %41 = arith.mulf %36, %40 : vector<64x16xf32>
    %cst_15 = arith.constant 2.430000e+00 : f32
    %42 = vector.broadcast %cst_15 : f32 to vector<64x16xf32>
    %43 = arith.mulf %42, %36 : vector<64x16xf32>
    %cst_16 = arith.constant 5.900000e-01 : f32
    %44 = vector.broadcast %cst_16 : f32 to vector<64x16xf32>
    %45 = arith.addf %43, %44 : vector<64x16xf32>
    %46 = arith.mulf %36, %45 : vector<64x16xf32>
    %cst_17 = arith.constant 1.400000e-01 : f32
    %47 = vector.broadcast %cst_17 : f32 to vector<64x16xf32>
    %48 = arith.addf %46, %47 : vector<64x16xf32>
    %49 = arith.divf %41, %48 : vector<64x16xf32>
    %cst_18 = arith.constant 0.000000e+00 : f32
    %cst_19 = arith.constant 1.000000e+00 : f32
    %50 = vector.broadcast %cst_18 : f32 to vector<64x16xf32>
    %51 = arith.maximumf %50, %49 : vector<64x16xf32>
    %52 = vector.broadcast %cst_19 : f32 to vector<64x16xf32>
    %53 = arith.minimumf %52, %51 : vector<64x16xf32>
    %54 = math.log %53 : vector<64x16xf32>
    %cst_20 = arith.constant 0.454545468 : f32
    %55 = vector.broadcast %cst_20 : f32 to vector<64x16xf32>
    %56 = arith.mulf %55, %54 : vector<64x16xf32>
    %57 = math.exp %56 : vector<64x16xf32>
    %c0_21 = arith.constant 0 : index
    %c0_22 = arith.constant 0 : index
    %58 = vector.load %arg3[%c0_21, %c0_22] : memref<16x128xf32, #tpu.memory_space<vmem>>, vector<16x128xf32>
    %c0_23 = arith.constant 0 : index
    %c0_24 = arith.constant 0 : index
    %59 = vector.load %arg4[%c0_23, %c0_24] : memref<32x64xf32, #tpu.memory_space<vmem>>, vector<32x64xf32>
    %cst_25 = arith.constant dense<0.000000e+00> : vector<64x128xf32>
    %60 = tpu.matmul %32, %58, %cst_25 {dimension_numbers = #tpu.dot_dimension_numbers<[1], [0], [0], [1], [0, 0, 1, 1], [], []>} : vector<64x16xf32>, vector<16x128xf32>, vector<64x128xf32> -> vector<64x128xf32>
    %cst_26 = arith.constant dense<0.000000e+00> : vector<32x128xf32>
    %61 = tpu.matmul %59, %60, %cst_26 {dimension_numbers = #tpu.dot_dimension_numbers<[1], [0], [0], [1], [0, 0, 1, 1], [], []>} : vector<32x64xf32>, vector<64x128xf32>, vector<32x128xf32> -> vector<32x128xf32>
    %cst_27 = arith.constant dense<0.000000e+00> : vector<64x128xf32>
    %62 = tpu.matmul %57, %58, %cst_27 {dimension_numbers = #tpu.dot_dimension_numbers<[1], [0], [0], [1], [0, 0, 1, 1], [], []>} : vector<64x16xf32>, vector<16x128xf32>, vector<64x128xf32> -> vector<64x128xf32>
    %cst_28 = arith.constant dense<0.000000e+00> : vector<32x128xf32>
    %63 = tpu.matmul %59, %62, %cst_28 {dimension_numbers = #tpu.dot_dimension_numbers<[1], [0], [0], [1], [0, 0, 1, 1], [], []>} : vector<32x64xf32>, vector<64x128xf32>, vector<32x128xf32> -> vector<32x128xf32>
    %64 = arith.mulf %32, %32 : vector<64x16xf32>
    %cst_29 = arith.constant dense<0.000000e+00> : vector<64x128xf32>
    %65 = tpu.matmul %64, %58, %cst_29 {dimension_numbers = #tpu.dot_dimension_numbers<[1], [0], [0], [1], [0, 0, 1, 1], [], []>} : vector<64x16xf32>, vector<16x128xf32>, vector<64x128xf32> -> vector<64x128xf32>
    %cst_30 = arith.constant dense<0.000000e+00> : vector<32x128xf32>
    %66 = tpu.matmul %59, %65, %cst_30 {dimension_numbers = #tpu.dot_dimension_numbers<[1], [0], [0], [1], [0, 0, 1, 1], [], []>} : vector<32x64xf32>, vector<64x128xf32>, vector<32x128xf32> -> vector<32x128xf32>
    %67 = arith.mulf %57, %57 : vector<64x16xf32>
    %cst_31 = arith.constant dense<0.000000e+00> : vector<64x128xf32>
    %68 = tpu.matmul %67, %58, %cst_31 {dimension_numbers = #tpu.dot_dimension_numbers<[1], [0], [0], [1], [0, 0, 1, 1], [], []>} : vector<64x16xf32>, vector<16x128xf32>, vector<64x128xf32> -> vector<64x128xf32>
    %cst_32 = arith.constant dense<0.000000e+00> : vector<32x128xf32>
    %69 = tpu.matmul %59, %68, %cst_32 {dimension_numbers = #tpu.dot_dimension_numbers<[1], [0], [0], [1], [0, 0, 1, 1], [], []>} : vector<32x64xf32>, vector<64x128xf32>, vector<32x128xf32> -> vector<32x128xf32>
    %70 = arith.mulf %32, %57 : vector<64x16xf32>
    %cst_33 = arith.constant dense<0.000000e+00> : vector<64x128xf32>
    %71 = tpu.matmul %70, %58, %cst_33 {dimension_numbers = #tpu.dot_dimension_numbers<[1], [0], [0], [1], [0, 0, 1, 1], [], []>} : vector<64x16xf32>, vector<16x128xf32>, vector<64x128xf32> -> vector<64x128xf32>
    %cst_34 = arith.constant dense<0.000000e+00> : vector<32x128xf32>
    %72 = tpu.matmul %59, %71, %cst_34 {dimension_numbers = #tpu.dot_dimension_numbers<[1], [0], [0], [1], [0, 0, 1, 1], [], []>} : vector<32x64xf32>, vector<64x128xf32>, vector<32x128xf32> -> vector<32x128xf32>
    %73 = arith.mulf %61, %61 : vector<32x128xf32>
    %74 = arith.subf %66, %73 : vector<32x128xf32>
    %75 = arith.mulf %63, %63 : vector<32x128xf32>
    %76 = arith.subf %69, %75 : vector<32x128xf32>
    %77 = arith.mulf %61, %63 : vector<32x128xf32>
    %78 = arith.subf %72, %77 : vector<32x128xf32>
    %cst_35 = arith.constant 2.000000e+00 : f32
    %79 = vector.broadcast %cst_35 : f32 to vector<32x128xf32>
    %80 = arith.mulf %79, %78 : vector<32x128xf32>
    %cst_36 = arith.constant 8.99999984E-4 : f32
    %81 = vector.broadcast %cst_36 : f32 to vector<32x128xf32>
    %82 = arith.addf %80, %81 : vector<32x128xf32>
    %83 = arith.addf %74, %76 : vector<32x128xf32>
    %cst_37 = arith.constant 8.99999984E-4 : f32
    %84 = vector.broadcast %cst_37 : f32 to vector<32x128xf32>
    %85 = arith.addf %83, %84 : vector<32x128xf32>
    %86 = arith.divf %82, %85 : vector<32x128xf32>
    %cst_38 = arith.constant 2.000000e+00 : f32
    %87 = vector.broadcast %cst_38 : f32 to vector<32x128xf32>
    %88 = arith.mulf %87, %61 : vector<32x128xf32>
    %89 = arith.mulf %88, %63 : vector<32x128xf32>
    %cst_39 = arith.constant 9.99999974E-5 : f32
    %90 = vector.broadcast %cst_39 : f32 to vector<32x128xf32>
    %91 = arith.addf %89, %90 : vector<32x128xf32>
    %92 = arith.mulf %61, %61 : vector<32x128xf32>
    %93 = arith.mulf %63, %63 : vector<32x128xf32>
    %94 = arith.addf %92, %93 : vector<32x128xf32>
    %cst_40 = arith.constant 9.99999974E-5 : f32
    %95 = vector.broadcast %cst_40 : f32 to vector<32x128xf32>
    %96 = arith.addf %94, %95 : vector<32x128xf32>
    %97 = arith.divf %91, %96 : vector<32x128xf32>
    %98 = arith.mulf %97, %86 : vector<32x128xf32>
    %99 = vector.shape_cast %98 : vector<32x128xf32> to vector<1x32x128xf32>
    %cst_41 = arith.constant dense<0.000000e+00> : vector<1xf32>
    %100 = vector.multi_reduction <add>, %99, %cst_41 [1, 2] : vector<1x32x128xf32> to vector<1xf32>
    %101 = vector.shape_cast %100 : vector<1xf32> to vector<1x1x1xf32>
    %102 = vector.extract %101[0, 0, 0] : f32 from vector<1x1x1xf32>
    %cst_42 = arith.constant 0.000000e+00 : f32
    %103 = vector.broadcast %cst_42 : f32 to vector<1x8x128xf32>
    %104 = vector.broadcast %7 : f32 to vector<1x8x128xf32>
    %105 = arith.addf %103, %104 : vector<1x8x128xf32>
    %c0_43 = arith.constant 0 : index
    %c0_44 = arith.constant 0 : index
    %c0_45 = arith.constant 0 : index
    %106 = vector.load %arg5[%c0_43, %c0_44, %c0_45] : memref<1x8x128xf32, #tpu.memory_space<vmem>>, vector<1x8x128xf32>
    tpu.vector_store %arg5[%c0_43, %c0_44, %c0_45], %105 {strides = array<i32>} : memref<1x8x128xf32, #tpu.memory_space<vmem>>, vector<1x8x128xf32>,
    %cst_46 = arith.constant 0.000000e+00 : f32
    %107 = vector.broadcast %cst_46 : f32 to vector<1x8x128xf32>
    %108 = vector.broadcast %102 : f32 to vector<1x8x128xf32>
    %109 = arith.addf %107, %108 : vector<1x8x128xf32>
    %c0_47 = arith.constant 0 : index
    %c0_48 = arith.constant 0 : index
    %c0_49 = arith.constant 0 : index
    %110 = vector.load %arg6[%c0_47, %c0_48, %c0_49] : memref<1x8x128xf32, #tpu.memory_space<vmem>>, vector<1x8x128xf32>
    tpu.vector_store %arg6[%c0_47, %c0_48, %c0_49], %109 {strides = array<i32>} : memref<1x8x128xf32, #tpu.memory_space<vmem>>, vector<1x8x128xf32>,
    return
  }
  func.func @transform_0(%arg0: i32) -> (i32, i32) {
    %c0_i32 = arith.constant 0 : i32
    %c0_i32_0 = arith.constant 0 : i32
    return %arg0, %c0_i32 : i32, i32
  }
  func.func @transform_1(%arg0: i32) -> (i32, i32) {
    %c0_i32 = arith.constant 0 : i32
    %c0_i32_0 = arith.constant 0 : i32
    return %arg0, %c0_i32 : i32, i32
  }
  func.func @transform_2(%arg0: i32) -> (i32, i32) {
    %c0_i32 = arith.constant 0 : i32
    %c0_i32_0 = arith.constant 0 : i32
    %c0_i32_1 = arith.constant 0 : i32
    return %c0_i32, %c0_i32_0 : i32, i32
  }
  func.func @transform_3(%arg0: i32) -> (i32, i32) {
    %c0_i32 = arith.constant 0 : i32
    %c0_i32_0 = arith.constant 0 : i32
    %c0_i32_1 = arith.constant 0 : i32
    return %c0_i32, %c0_i32_0 : i32, i32
  }
  func.func @transform_4(%arg0: i32) -> (i32, i32, i32) {
    %c0_i32 = arith.constant 0 : i32
    %c0_i32_0 = arith.constant 0 : i32
    %c0_i32_1 = arith.constant 0 : i32
    return %arg0, %c0_i32, %c0_i32_0 : i32, i32, i32
  }
  func.func @transform_5(%arg0: i32) -> (i32, i32, i32) {
    %c0_i32 = arith.constant 0 : i32
    %c0_i32_0 = arith.constant 0 : i32
    %c0_i32_1 = arith.constant 0 : i32
    return %arg0, %c0_i32, %c0_i32_0 : i32, i32, i32
  }
}

</mosaic_0001>

<bundles_post_ra>
// kernel: tpu_custom_call.1
= control target key start
LH: loop header
LB: loop body
LE: loop exit
PB: predicated region body
PF: predicated region fallthrough
CT: control target
= control target key end

     0   :  { %11 = vsyncpa [#allocation3], 0  ;;  %s3026_s0 = inlined_call_operand.vmem [shape: f32[128,16], index: 0, kind: input, shape index: {}]   ;;  %s3027_s1 = inlined_call_operand.vmem [shape: f32[128,16], index: 1, kind: input, shape index: {}]   ;;  %s3028_s2 = inlined_call_operand.vmem [shape: f32[16,128], index: 2, kind: input, shape index: {}]   ;;  %s3029_s3 = inlined_call_operand.vmem [shape: f32[32,64], index: 3, kind: input, shape index: {}]   ;;  %s3030_s4 = inlined_call_operand.hbm [shape: f32[2,8,128], index: 4, kind: output, shape index: {0}]   ;;  %s3031_s5 = inlined_call_operand.hbm [shape: f32[2,8,128], index: 5, kind: output, shape index: {1}]  }
   0x1   :  { %13 = vsyncpa [#allocation3 + $0x1], 0 }
   0x2   :  { %14 = vsyncpa [#allocation5], 0 }
   0x3   :  { %16 = vsyncpa [#allocation5 + $0x1], 0  ;;  %s2165_s18 = smov 0   ;;  %s2167_s19 = smov 0  }
   0x4   :  { %s2169_s20 = smov 0   ;;  %s2171_s21 = smov 0  }
   0x5 LB: > { %s1712_s22 = sadd.s32 4294967295, %s2133_s21   ;;  %s1713_s23 = sadd.s32 4294967294, %s2133_s21   ;;  %s2133_s21 = sphi %s2171_s21, %s3095_s21   ;;  %s2129_s20 = sphi %s2169_s20, %s3094_s20   ;;  %s2125_s19 = sphi %s2167_s19, %s3093_s19   ;;  %s2121_s18 = sphi %s2165_s18, %s3092_s18  }
   0x6   : > { %s2188_s24 = sadd.s32 1, %s2133_s21   ;;  %s123_s25 = sadd.s32 1, %s2129_s20 }
   0x7   : > { %s120_s26 = ssub.s32 %s2133_s21, %s2188_s24  ;;  %p133_p0 = scmp.ne.s32.totalorder %s2129_s20, %s2125_s19 }
   0x8   : > { %p121_p1 = scmp.eq.s32.totalorder %s120_s26, 0  ;;  %p134_p2 = scmp.eq.s32.totalorder %s1712_s22, 1 }
   0x9   : > { %p139_p3 = scmp.ne.s32.totalorder %s2125_s19, %s2121_s18  ;;  %p140_p4 = scmp.eq.s32.totalorder %s1713_s23, 1 }
   0xa   : > { %s2198_s27 = scalar_select %p121_p1, %s2129_s20, %s123_s25  }
   0xb   : > { %p2200_p5 = por %p134_p2, %p133_p0  ;;  %p2204_p6 = por %p140_p4, %p139_p3 }
   0xc   : > { %p1716_p7 = scmp.ge.s32.totalorder %s2133_s21, 1  ;;  %p208_p8 = scmp.lt.s32.totalorder %s2133_s21, 3 }
   0xe   : > { %p209_p9 = pnand %p1716_p7, %p208_p8 }
   0xf   : > { %s2216_s9 = sshll.u32 (!%p209_p9), %s1712_s22, 3  ;;  %s2059_s12 = scalar_lea.hbm (!%p209_p9), %s3030_s4, 16 }
  0x10   : > { %212 = sbr.rel (%p209_p9) target bundleno = 1168 (0x490), region = 36  ;;  %p247_p10 = scmp.lt.s32.totalorder (!%p209_p9), %s2216_s9, 15 }
  0x11   : > { %s1590_s22 = scalar_lea.hbm (!%p209_p9), %s3030_s4, %s2216_s9 }
  0x12   : > { %s1594_s26 = sshll.u32 (!%p209_p9), %s1590_s22, 4  ;;  %s1595_s26 = int_to_ptr.hbm [resolvable:$true] %s1594_s26 }
  0x13   : > { %s2053_s7 = sshra.s32 (!%p209_p9), %s1595_s26, 4  ;;  %s2054_s7 = int_to_ptr.hbm [resolvable:$true] %s2053_s7 }
  0x14   : > { %s2055_s8 = scalar_lea.hbm (!%p209_p9), %s2054_s7, 8  ;;  %p2060_p0 = scmp.lt.s32.totalorder (!%p209_p9), %s2054_s7, %s3030_s4 }
  0x15   : > { %v860_v0 = vld [vmem:[%s3028_s2 + $0x8] sm:$0xff]  ;;  %v859_v1 = vld [vmem:[%s3028_s2] sm:$0xff]  ;;  %s248_s10 = scalar_select %p247_p10, %s2216_s9, 15 }
  0x16   : > { %903 = vmatpush.msra.mxu0 %v860_v0  ;;  %1010 = vmatpush.msra.mxu2 %v860_v0  ;;  %p2056_p11 = scmp.ne.s32.totalorder %s2054_s7, %s2055_s8  ;;  %p2061_p1 = scmp.lt.s32.totalorder %s2059_s12, %s2055_s8 }
  0x17   : > { %s1720_s11 = sshll.u32 %s248_s10, 3 }
  0x18   : > { %904 = vmatpush.msra.mxu0 %v859_v1  ;;  %1011 = vmatpush.msra.mxu2 %v859_v1  ;;  %s2223_s14 = scalar_lea.vmem %s3026_s0, %s1720_s11  ;;  %s2228_s17 = scalar_lea.vmem %s3027_s1, %s1720_s11 }
  0x19   : > { %v258_v2 = vld [vmem:[%s2223_s14] sm:$0xff]  ;;  %v259_v4 = vld [vmem:[%s2223_s14 + $0x8] sm:$0xff]  ;;  %v260_v6 = vld [vmem:[%s2223_s14 + $0x10] sm:$0xff]  ;;  %p2057_p12 = pnand %p2056_p11, %p2200_p5  ;;  %p2062_p2 = por %p2061_p1, %p2060_p0 }
  0x1a   : > { %1214 = vmatpush.msrb.mxu0 %v860_v0  ;;  %v266_v3 = vld [vmem:[%s2228_s17] sm:$0xff]  ;;  %1845 = vlog2.f32 %v258_v2  ;;  %v267_v5 = vld [vmem:[%s2228_s17 + $0x8] sm:$0xff]  ;;  %v268_v7 = vld [vmem:[%s2228_s17 + $0x10] sm:$0xff] }
  0x1b   : > { %1847 = vlog2.f32 %v266_v3  ;;  %v261_v8 = vld [vmem:[%s2223_s14 + $0x18] sm:$0xff]  ;;  %v262_v51 = vld [vmem:[%s2223_s14 + $0x20] sm:$0xff]  ;;  %p2058_p13 = pneg %p2057_p12 }
  0x1c   : > { %1215 = vmatpush.msrb.mxu0 %v859_v1  ;;  %1849 = vlog2.f32 %v259_v4  ;;  %v269_v9 = vld [vmem:[%s2228_s17 + $0x18] sm:$0xff] }
  0x1d   : > { %1851 = vlog2.f32 %v267_v5  ;;  %p2063_p3 = pnand %p2062_p2, %p2058_p13 }
  0x1e   : > { %1853 = vlog2.f32 %v260_v6 }
  0x1f   : > { %1855 = vlog2.f32 %v268_v7 }
  0x20   : > { %v1846_v10 = vpop.eup %1845  ;;  %1857 = vlog2.f32 %v261_v8 }
  0x21   : > { %v1848_v11 = vpop.eup %1847  ;;  %v316_v12 = vmul.f32 0.6931472, %v1846_v10  ;;  %1859 = vlog2.f32 %v269_v9 }
  0x22   : > { %v1850_v13 = vpop.eup %1849  ;;  %v588_v14 = vmul.f32 0.6931472, %v1848_v11 }
  0x23   : > { %v1852_v15 = vpop.eup %1851  ;;  %v331_v16 = vmul.f32 2.2, %v316_v12  ;;  %v318_v17 = vmul.f32 0.6931472, %v1850_v13 }
  0x24   : > { %v1854_v18 = vpop.eup %1853  ;;  %v603_v19 = vmul.f32 2.2, %v588_v14  ;;  %v590_v20 = vmul.f32 0.6931472, %v1852_v15 }
  0x25   : > { %v1856_v21 = vpop.eup %1855  ;;  %v339_v22 = vmul.f32 1.442695, %v331_v16  ;;  %v332_v23 = vmul.f32 2.2, %v318_v17  ;;  %v320_v24 = vmul.f32 0.6931472, %v1854_v18 }
  0x26   : > { %v1858_v25 = vpop.eup %1857  ;;  %v611_v26 = vmul.f32 1.442695, %v603_v19  ;;  %v604_v27 = vmul.f32 2.2, %v590_v20  ;;  %v592_v28 = vmul.f32 0.6931472, %v1856_v21 }
  0x27   : > { %v1860_v29 = vpop.eup %1859  ;;  %1861 = vpow2.f32 %v339_v22  ;;  %v341_v30 = vmul.f32 1.442695, %v332_v23  ;;  %v333_v31 = vmul.f32 2.2, %v320_v24  ;;  %v322_v32 = vmul.f32 0.6931472, %v1858_v25 }
  0x28   : > { %1863 = vpow2.f32 %v611_v26  ;;  %v613_v33 = vmul.f32 1.442695, %v604_v27  ;;  %v605_v34 = vmul.f32 2.2, %v592_v28  ;;  %v594_v35 = vmul.f32 0.6931472, %v1860_v29 }
  0x29   : > { %1865 = vpow2.f32 %v341_v30  ;;  %v334_v36 = vmul.f32 2.2, %v322_v32  ;;  %v343_v37 = vmul.f32 1.442695, %v333_v31 }
  0x2a   : > { %1867 = vpow2.f32 %v613_v33  ;;  %v606_v38 = vmul.f32 2.2, %v594_v35  ;;  %v615_v39 = vmul.f32 1.442695, %v605_v34 }
  0x2b   : > { %v345_v41 = vmul.f32 1.442695, %v334_v36  ;;  %1869 = vpow2.f32 %v343_v37 }
  0x2c   : > { %v617_v44 = vmul.f32 1.442695, %v606_v38  ;;  %1871 = vpow2.f32 %v615_v39 }
  0x2d   : > { %v1862_v40 = vpop.eup %1861  ;;  %1873 = vpow2.f32 %v345_v41 }
  0x2e   : > { %v1864_v42 = vpop.eup %1863  ;;  %v379_v43 = vmul.f32 2.43, %v1862_v40  ;;  %v355_v46 = vmul.f32 2.51, %v1862_v40  ;;  %1875 = vpow2.f32 %v617_v44 }
  0x2f   : > { %v1866_v45 = vpop.eup %1865  ;;  %v651_v47 = vmul.f32 2.43, %v1864_v42  ;;  %v627_v50 = vmul.f32 2.51, %v1864_v42  ;;  %1877 = vlog2.f32 %v262_v51 }
  0x30   : > { %v1868_v48 = vpop.eup %1867  ;;  %v387_v49 = vadd.f32 0.59, %v379_v43  ;;  %v356_v53 = vmul.f32 2.51, %v1866_v45  ;;  %v380_v54 = vmul.f32 2.43, %v1866_v45 }
  0x31   : > { %v659_v52 = vadd.f32 0.59, %v651_v47  ;;  %v363_v56 = vadd.f32 0.03, %v355_v46  ;;  %v652_v59 = vmul.f32 2.43, %v1868_v48  ;;  %v1870_v60 = vpop.eup %1869 }
  0x32   : > { %v395_v55 = vmul.f32 %v1862_v40, %v387_v49  ;;  %v388_v58 = vadd.f32 0.59, %v380_v54  ;;  %v635_v62 = vadd.f32 0.03, %v627_v50  ;;  %v628_v63 = vmul.f32 2.51, %v1868_v48  ;;  %v2241_v4 = vpop.eup %1871 }
  0x33   : > { %v667_v57 = vmul.f32 %v1864_v42, %v659_v52  ;;  %v364_v1 = vadd.f32 0.03, %v356_v53  ;;  %v660_v3 = vadd.f32 0.59, %v652_v59  ;;  %v357_v5 = vmul.f32 2.51, %v1870_v60  ;;  %v2243_v6 = vpop.eup %1873 }
  0x34   : > { %v403_v61 = vadd.f32 0.14, %v395_v55  ;;  %v396_v2 = vmul.f32 %v1866_v45, %v388_v58  ;;  %v381_v9 = vmul.f32 2.43, %v1870_v60  ;;  %v2246_v10 = vpop.eup %1875  ;;  %v2248_v11 = vmul.f32 %v1862_v40, %v363_v56 }
  0x35   : > { %v2239_v0 = vadd.f32 0.14, %v667_v57  ;;  %v636_v14 = vadd.f32 0.03, %v628_v63  ;;  %v2253_v15 = vmul.f32 %v1864_v42, %v635_v62  ;;  %v2256_v17 = vmul.f32 %v1866_v45, %v364_v1  ;;  %v2258_v19 = vpop.eup %1877 }
  0x36   : > { %1879 = vrcp.f32 %v403_v61  ;;  %v420_v7 = vand.u32 2147483647, %v403_v61  ;;  %v422_v8 = vand.u32 2147483648, %v403_v61  ;;  %v2251_v13 = vadd.f32 0.14, %v396_v2 }
  0x37   : > { %1881 = vrcp.f32 %v2239_v0  ;;  %v692_v12 = vand.u32 2147483647, %v2239_v0  ;;  %v694_v16 = vand.u32 2147483648, %v2239_v0  ;;  %v668_v18 = vmul.f32 %v1868_v48, %v660_v3 }
  0x38   : > { %vm416_vm0 = vweird.f32 %v403_v61  ;;  %vm688_vm1 = vweird.f32 %v2239_v0  ;;  %1883 = vrcp.f32 %v2251_v13  ;;  %v365_v20 = vadd.f32 0.03, %v357_v5 }
  0x39   : > { %vm2262_vm2 = vcmp.eq.f32.partialorder %v420_v7, 8.507059e+37  ;;  %v423_v22 = vor.u32 1.1754944e-38, %v422_v8  ;;  %v2266_v23 = vadd.f32 0.14, %v668_v18  ;;  %v389_v24 = vadd.f32 0.59, %v381_v9 }
  0x3a   : > { %vm2268_vm3 = vcmp.eq.f32.partialorder %v692_v12, 8.507059e+37  ;;  %v435_v27 = vand.u32 2147483647, %v2251_v13  ;;  %v2273_v28 = vmul.f32 %v1868_v48, %v636_v14  ;;  %v653_v29 = vmul.f32 2.43, %v2241_v4 }
  0x3b   : > { %v695_v32 = vor.u32 1.1754944e-38, %v694_v16  ;;  %v437_v33 = vand.u32 2147483648, %v2251_v13  ;;  %1885 = vrcp.f32 %v2266_v23  ;;  %vm431_vm4 = vweird.f32 %v2251_v13 }
  0x3c   : > { %v1880_v25 = vpop.eup %1879  ;;  %v2280_v35 = vmul.f32 %v1870_v60, %v365_v20  ;;  %v629_v36 = vmul.f32 2.51, %v2241_v4  ;;  %v397_v38 = vmul.f32 %v1870_v60, %v389_v24  ;;  %v661_v39 = vadd.f32 0.59, %v653_v29 }
  0x3d   : > { %v1882_v30 = vpop.eup %1881  ;;  %v412_v31 = vmul.f32 %v1880_v25, %v403_v61  ;;  %vm417_vm5 = vweird.f32 %v1880_v25  ;;  %vm2283_vm7 = vcmp.eq.f32.partialorder %v435_v27, 8.507059e+37  ;;  %v707_v43 = vand.u32 2147483647, %v2266_v23 }
  0x3e   : > { %v684_v34 = vmul.f32 %v1882_v30, %v2239_v0  ;;  %v1884_v40 = vpop.eup %1883  ;;  %vm689_vm6 = vweird.f32 %v1882_v30  ;;  %v438_v46 = vor.u32 1.1754944e-38, %v437_v33  ;;  %v405_v47 = vadd.f32 0.14, %v397_v38  ;;  %vm2290_vm8 = vmor %vm416_vm0, %vm417_vm5 }
  0x3f   : > { %v413_v37 = vsub.f32 1.0, %v412_v31  ;;  %v427_v45 = vmul.f32 %v1884_v40, %v2251_v13  ;;  %vm703_vm9 = vweird.f32 %v2266_v23  ;;  %v709_v50 = vand.u32 2147483648, %v2266_v23  ;;  %vm2299_vm10 = vmor %vm688_vm1, %vm689_vm6 }
  0x40   : > { %v685_v41 = vsub.f32 1.0, %v684_v34  ;;  %v669_v51 = vmul.f32 %v2241_v4, %v661_v39  ;;  %vm432_vm11 = vweird.f32 %v1884_v40  ;;  %1887 = vrcp.f32 %v405_v47 }
  0x41   : > { %v414_v44 = vmul.f32 %v1880_v25, %v413_v37  ;;  %v1886_v52 = vpop.eup %1885  ;;  %v428_v55 = vsub.f32 1.0, %v427_v45  ;;  %vm2304_vm12 = vcmp.eq.f32.partialorder %v707_v43, 8.507059e+37  ;;  %v637_v59 = vadd.f32 0.03, %v629_v36  ;;  %vm2318_vm14 = vmor %vm431_vm4, %vm432_vm11 }
  0x42   : > { %v686_v49 = vmul.f32 %v1882_v30, %v685_v41  ;;  %v699_v57 = vmul.f32 %v1886_v52, %v2266_v23  ;;  %vm704_vm13 = vweird.f32 %v1886_v52  ;;  %v2310_v62 = vadd.f32 0.14, %v669_v51 }
  0x43   : > { %v415_v53 = vadd.f32 %v1880_v25, %v414_v44  ;;  %v429_v61 = vmul.f32 %v1884_v40, %v428_v55  ;;  %v450_v3 = vand.u32 2147483647, %v405_v47  ;;  %v452_v9 = vand.u32 2147483648, %v405_v47  ;;  %vm2332_vm15 = vmor %vm703_vm9, %vm704_vm13 }
  0x44   : > { %v687_v56 = vadd.f32 %v1882_v30, %v686_v49  ;;  %v700_v2 = vsub.f32 1.0, %v699_v57  ;;  %v710_v16 = vor.u32 1.1754944e-38, %v709_v50  ;;  %1889 = vrcp.f32 %v2310_v62 }
  0x45   : > { %v419_v60 = vsel %vm2290_vm8, %v1880_v25, %v415_v53  ;;  %v430_v8 = vadd.f32 %v1884_v40, %v429_v61  ;;  %vm446_vm0 = vweird.f32 %v405_v47  ;;  %v2337_v21 = vmul.f32 %v2241_v4, %v637_v59 }
  0x46   : > { %v424_v63 = vsel %vm2262_vm2, %v423_v22, %v419_v60  ;;  %v691_v0 = vsel %vm2299_vm10, %v1882_v30, %v687_v56  ;;  %v701_v14 = vmul.f32 %v1886_v52, %v700_v2  ;;  %v1888_v13 = vpop.eup %1887  ;;  %vm2342_vm1 = vcmp.eq.f32.partialorder %v450_v3, 8.507059e+37 }
  0x47   : > { %v425_v5 = vmul.f32 %v424_v63, %v2248_v11  ;;  %v696_v7 = vsel %vm2268_vm3, %v695_v32, %v691_v0  ;;  %v434_v20 = vsel %vm2318_vm14, %v1884_v40, %v430_v8  ;;  %v442_v25 = vmul.f32 %v1888_v13, %v405_v47 }
  0x48   : > { %v697_v12 = vmul.f32 %v696_v7, %v2253_v15  ;;  %v439_v22 = vsel %vm2283_vm7, %v438_v46, %v434_v20  ;;  %v702_v24 = vadd.f32 %v1886_v52, %v701_v14  ;;  %v453_v23 = vor.u32 1.1754944e-38, %v452_v9 }
  0x49   : > { %v531_v18 = vmax.f32 %v425_v5, 0.0  ;;  %v440_v27 = vmul.f32 %v439_v22, %v2256_v17  ;;  %v443_v4 = vsub.f32 1.0, %v442_v25  ;;  %vm447_vm2 = vweird.f32 %v1888_v13 }
  0x4a   : > { %v803_v15 = vmax.f32 %v697_v12, 0.0  ;;  %v706_v31 = vsel %vm2332_vm15, %v1886_v52, %v702_v24  ;;  %v382_v34 = vmul.f32 2.43, %v2243_v6  ;;  %v1890_v36 = vpop.eup %1889  ;;  %v722_v38 = vand.u32 2147483647, %v2310_v62  ;;  %vm2354_vm3 = vmor %vm446_vm0, %vm447_vm2 }
  0x4b   : > { %v539_v26 = vmin.f32 %v531_v18, 1.0  ;;  %v532_v32 = vmax.f32 %v440_v27, 0.0  ;;  %v711_v33 = vsel %vm2304_vm12, %v710_v16, %v706_v31  ;;  %v444_v37 = vmul.f32 %v1888_v13, %v443_v4 }
  0x4c   : > { %v811_v30 = vmin.f32 %v803_v15, 1.0  ;;  %v712_v17 = vmul.f32 %v711_v33, %v2273_v28  ;;  %v714_v41 = vmul.f32 %v1890_v36, %v2310_v62  ;;  %vm718_vm4 = vweird.f32 %v2310_v62 }
  0x4d   : > { %1891 = vlog2.f32 %v539_v26  ;;  %v540_v39 = vmin.f32 %v532_v32, 1.0  ;;  %v390_v42 = vadd.f32 0.59, %v382_v34  ;;  %v445_v44 = vadd.f32 %v1888_v13, %v444_v37 }
  0x4e   : > { %1893 = vlog2.f32 %v811_v30  ;;  %v804_v43 = vmax.f32 %v712_v17, 0.0  ;;  %v724_v45 = vand.u32 2147483648, %v2310_v62  ;;  %v654_v28 = vmul.f32 2.43, %v2246_v10 }
  0x4f   : > { %1895 = vlog2.f32 %v540_v39  ;;  %v715_v46 = vsub.f32 1.0, %v714_v41  ;;  %vm719_vm5 = vweird.f32 %v1890_v36  ;;  %v398_v47 = vmul.f32 %v2243_v6, %v390_v42  ;;  %v271_v42 = vld [vmem:[%s2228_s17 + $0x28] sm:$0xff] }
  0x50   : > { %v812_v48 = vmin.f32 %v804_v43, 1.0  ;;  %v449_v49 = vsel %vm2354_vm3, %v1888_v13, %v445_v44  ;;  %vm2365_vm6 = vcmp.eq.f32.partialorder %v722_v38, 8.507059e+37  ;;  %v662_v51 = vadd.f32 0.59, %v654_v28  ;;  %vm2378_vm7 = vmor %vm718_vm4, %vm719_vm5  ;;  %v263_v38 = vld [vmem:[%s2223_s14 + $0x28] sm:$0xff] }
  0x51   : > { %v454_v53 = vsel %vm2342_vm1, %v453_v23, %v449_v49  ;;  %v716_v54 = vmul.f32 %v1890_v36, %v715_v46  ;;  %v2371_v55 = vadd.f32 0.14, %v398_v47  ;;  %v324_v56 = vmul.f32 0.6931472, %v2258_v19  ;;  %v264_v46 = vld [vmem:[%s2223_s14 + $0x30] sm:$0xff] }
  0x52   : > { %1897 = vlog2.f32 %v812_v48  ;;  %v455_v59 = vmul.f32 %v454_v53, %v2280_v35  ;;  %v725_v61 = vor.u32 1.1754944e-38, %v724_v45  ;;  %v670_v1 = vmul.f32 %v2246_v10, %v662_v51  ;;  %v272_v53 = vld [vmem:[%s2228_s17 + $0x30] sm:$0xff] }
  0x53   : > { %v1892_v52 = vpop.eup %1891  ;;  %v717_v0 = vadd.f32 %v1890_v36, %v716_v54  ;;  %1899 = vrcp.f32 %v2371_v55  ;;  %v358_v3 = vmul.f32 2.51, %v2243_v6  ;;  %v335_v7 = vmul.f32 2.2, %v324_v56 }
  0x54   : > { %v1894_v57 = vpop.eup %1893  ;;  %v548_v58 = vmul.f32 0.6931472, %v1892_v52  ;;  %v533_v2 = vmax.f32 %v455_v59, 0.0  ;;  %vm290_vm8 = vcmask 130048   ;;  %v2390_v18 = vadd.f32 0.14, %v670_v1 }
  0x55   : > { %v820_v63 = vmul.f32 0.6931472, %v1894_v57  ;;  %v1896_v5 = vpop.eup %1895  ;;  %v721_v62 = vsel %vm2378_vm7, %v1890_v36, %v717_v0  ;;  %v366_v15 = vadd.f32 0.03, %v358_v3  ;;  %v630_v22 = vmul.f32 2.51, %v2246_v10 }
  0x56   : > { %v563_v19 = vmul.f32 0.45454547, %v548_v58  ;;  %v550_v9 = vmul.f32 0.6931472, %v1896_v5  ;;  %v541_v12 = vmin.f32 %v533_v2, 1.0  ;;  %v726_v14 = vsel %vm2365_vm6, %v725_v61, %v721_v62  ;;  %v270_v36 = vld [vmem:[%s2228_s17 + $0x20] sm:$0xff] }
  0x57   : > { %v835_v35 = vmul.f32 0.45454547, %v820_v63  ;;  %v727_v13 = vmul.f32 %v726_v14, %v2337_v21  ;;  %vm461_vm9 = vweird.f32 %v2371_v55  ;;  %v347_v21 = vmul.f32 1.442695, %v335_v7  ;;  %v265_v57 = vld [vmem:[%s2223_s14 + $0x38] sm:$0xff] }
  0x58   : > { %v571_v8 = vmul.f32 1.442695, %v563_v19  ;;  %v1898_v20 = vpop.eup %1897  ;;  %v564_v11 = vmul.f32 0.45454547, %v550_v9  ;;  %v467_v31 = vand.u32 2147483648, %v2371_v55  ;;  %v374_v44 = vmul.f32 %v2243_v6, %v366_v15  ;;  %v273_v62 = vld [vmem:[%s2228_s17 + $0x38] sm:$0xff] }
  0x59   : > { %v843_v16 = vmul.f32 1.442695, %v835_v35  ;;  %v1900_v24 = vpop.eup %1899  ;;  %v822_v25 = vmul.f32 0.6931472, %v1898_v20  ;;  %v805_v26 = vmax.f32 %v727_v13, 0.0  ;;  %vm733_vm13 = vweird.f32 %v2390_v18 }
  0x5a   : > { %1901 = vpow2.f32 %v571_v8  ;;  %v573_v27 = vmul.f32 1.442695, %v564_v11  ;;  %v457_v29 = vmul.f32 %v1900_v24, %v2371_v55  ;;  %vm462_vm10 = vweird.f32 %v1900_v24 }
  0x5b   : > { %1903 = vpow2.f32 %v843_v16  ;;  %v836_v23 = vmul.f32 0.45454547, %v822_v25  ;;  %v813_v30 = vmin.f32 %v805_v26, 1.0  ;;  %v465_v32 = vand.u32 2147483647, %v2371_v55  ;;  %vm2408_vm11 = vmor %vm461_vm9, %vm462_vm10 }
  0x5c   : > { %1905 = vlog2.f32 %v541_v12  ;;  %v458_v4 = vsub.f32 1.0, %v457_v29  ;;  %v638_v34 = vadd.f32 0.03, %v630_v22  ;;  %v468_v41 = vor.u32 1.1754944e-38, %v467_v31 }
  0x5d   : > { %1907 = vrcp.f32 %v2390_v18  ;;  %v845_v33 = vmul.f32 1.442695, %v836_v23  ;;  %vm2416_vm12 = vcmp.eq.f32.partialorder %v465_v32, 8.507059e+37  ;;  %v737_v50 = vand.u32 2147483647, %v2390_v18 }
  0x5e   : > { %1909 = vpow2.f32 %v573_v27  ;;  %v459_v37 = vmul.f32 %v1900_v24, %v458_v4  ;;  %v646_v49 = vmul.f32 %v2246_v10, %v638_v34  ;;  %v739_v10 = vand.u32 2147483648, %v2390_v18 }
  0x5f   : > { %1911 = vlog2.f32 %v813_v30  ;;  %vm2438_vm15 = vcmp.eq.f32.partialorder %v737_v50, 8.507059e+37 }
  0x60   : > { %v2399_v17 = vpop.eup %1901  ;;  %1913 = vpow2.f32 %v347_v21  ;;  %v460_v45 = vadd.f32 %v1900_v24, %v459_v37  ;;  %v740_v9 = vor.u32 1.1754944e-38, %v739_v10 }
  0x61   : > { %v2402_v39 = vpop.eup %1903  ;;  %1723 = vmatmul.msk.f32.vlgmr.msra.gmra.mxu0 %vm290_vm8, %v2399_v17  ;;  %1915 = vpow2.f32 %v845_v33 }
  0x62   : > { %v1906_v43 = vpop.eup %1905  ;;  %1735 = vmatmul.msk.f32.vlgmr.msra.gmra.mxu2 %vm290_vm8, %v2402_v39  ;;  %1917 = vlog2.f32 %v270_v36  ;;  %v464_v6 = vsel %vm2408_vm11, %v1900_v24, %v460_v45 }
  0x63   : > { %v1908_v47 = vpop.eup %1907  ;;  %v552_v48 = vmul.f32 0.6931472, %v1906_v43  ;;  %1919 = vlog2.f32 %v263_v38  ;;  %v469_v56 = vsel %vm2416_vm12, %v468_v41, %v464_v6 }
  0x64   : > { %v2423_v51 = vpop.eup %1909  ;;  %v729_v52 = vmul.f32 %v1908_v47, %v2390_v18  ;;  %1921 = vlog2.f32 %v271_v42  ;;  %v470_v60 = vmul.f32 %v469_v56, %v374_v44  ;;  %vm734_vm14 = vweird.f32 %v1908_v47 }
  0x65   : > { %v1912_v54 = vpop.eup %1911  ;;  %v565_v55 = vmul.f32 0.45454547, %v552_v48  ;;  %1923 = vlog2.f32 %v264_v46  ;;  %vm2449_vm0 = vmor %vm733_vm13, %vm734_vm14 }
  0x66   : > { %v2434_v58 = vpop.eup %1913  ;;  %v824_v59 = vmul.f32 0.6931472, %v1912_v54  ;;  %v730_v61 = vsub.f32 1.0, %v729_v52  ;;  %1925 = vlog2.f32 %v272_v53  ;;  %v534_v5 = vmax.f32 %v470_v60, 0.0 }
  0x67   : > { %v2436_v63 = vpop.eup %1915  ;;  %v575_v0 = vmul.f32 1.442695, %v565_v55  ;;  %v383_v19 = vmul.f32 2.43, %v2434_v58  ;;  %1927 = vlog2.f32 %v265_v57  ;;  %v359_v42 = vmul.f32 2.51, %v2434_v58 }
  0x68   : > { %v1918_v2 = vpop.eup %1917  ;;  %v837_v3 = vmul.f32 0.45454547, %v824_v59  ;;  %v731_v35 = vmul.f32 %v1908_v47, %v730_v61  ;;  %v542_v20 = vmin.f32 %v534_v5, 1.0 }
  0x69   : > { %v1920_v7 = vpop.eup %1919  ;;  %1724 = vmatmul.msk.f32.gmra.mxu0 %vm290_vm8, %v2423_v51  ;;  %1929 = vpow2.f32 %v575_v0  ;;  %v391_v12 = vadd.f32 0.59, %v383_v19  ;;  %v596_v14 = vmul.f32 0.6931472, %v1918_v2  ;;  %v367_v53 = vadd.f32 0.03, %v359_v42 }
  0x6a   : > { %v1922_v16 = vpop.eup %1921  ;;  %1736 = vmatmul.msk.f32.gmra.mxu2 %vm290_vm8, %v2436_v63  ;;  %v847_v13 = vmul.f32 1.442695, %v837_v3  ;;  %v732_v11 = vadd.f32 %v1908_v47, %v731_v35  ;;  %v326_v15 = vmul.f32 0.6931472, %v1920_v7  ;;  %1931 = vlog2.f32 %v273_v62 }
  0x6b   : > { %v1924_v22 = vpop.eup %1923  ;;  %v399_v24 = vmul.f32 %v2434_v58, %v391_v12  ;;  %v607_v25 = vmul.f32 2.2, %v596_v14  ;;  %v598_v18 = vmul.f32 0.6931472, %v1922_v16  ;;  %v375_v5 = vmul.f32 %v2434_v58, %v367_v53 }
  0x6c   : > { %1933 = vpow2.f32 %v847_v13  ;;  %v736_v26 = vsel %vm2449_vm0, %v1908_v47, %v732_v11  ;;  %v336_v27 = vmul.f32 2.2, %v326_v15  ;;  %v328_v29 = vmul.f32 0.6931472, %v1924_v22  ;;  %v1926_v21 = vpop.eup %1925 }
  0x6d   : > { %1935 = vlog2.f32 %v542_v20  ;;  %v741_v23 = vsel %vm2438_vm15, %v740_v9, %v736_v26  ;;  %v407_v30 = vadd.f32 0.14, %v399_v24  ;;  %v619_v31 = vmul.f32 1.442695, %v607_v25  ;;  %v1928_v4 = vpop.eup %1927 }
  0x6e   : > { %v742_v32 = vmul.f32 %v741_v23, %v646_v49  ;;  %v349_v33 = vmul.f32 1.442695, %v336_v27  ;;  %v608_v34 = vmul.f32 2.2, %v598_v18  ;;  %v337_v36 = vmul.f32 2.2, %v328_v29 }
  0x6f   : > { %v2460_v37 = vpop.eup %1929  ;;  %1937 = vrcp.f32 %v407_v30  ;;  %v600_v44 = vmul.f32 0.6931472, %v1926_v21  ;;  %v330_v46 = vmul.f32 0.6931472, %v1928_v4  ;;  %v480_v48 = vand.u32 2147483647, %v407_v30 }
  0x70   : > { %v806_v38 = vmax.f32 %v742_v32, 0.0  ;;  %1939 = vpow2.f32 %v619_v31  ;;  %v621_v40 = vmul.f32 1.442695, %v608_v34  ;;  %v1932_v41 = vpop.eup %1931  ;;  %v351_v43 = vmul.f32 1.442695, %v337_v36 }
  0x71   : > { %1725 = vmatmul.msk.f32.gmra.mxu0 %vm290_vm8, %v2460_v37  ;;  %1941 = vpow2.f32 %v349_v33  ;;  %v609_v49 = vmul.f32 2.2, %v600_v44  ;;  %v482_v6 = vand.u32 2147483648, %v407_v30  ;;  %v602_v54 = vmul.f32 0.6931472, %v1932_v41 }
  0x72   : > { %v2465_v45 = vpop.eup %1933  ;;  %v814_v28 = vmin.f32 %v806_v38, 1.0  ;;  %1943 = vpow2.f32 %v621_v40  ;;  %v338_v57 = vmul.f32 2.2, %v330_v46  ;;  %vm476_vm1 = vweird.f32 %v407_v30 }
  0x73   : > { %v1936_v47 = vpop.eup %1935  ;;  %1737 = vmatmul.msk.f32.gmra.mxu2 %vm290_vm8, %v2465_v45  ;;  %vm2471_vm2 = vcmp.eq.f32.partialorder %v480_v48, 8.507059e+37  ;;  %v623_v0 = vmul.f32 1.442695, %v609_v49  ;;  %v483_v2 = vor.u32 1.1754944e-38, %v482_v6  ;;  %v610_v7 = vmul.f32 2.2, %v602_v54 }
  0x74   : > { %v554_v50 = vmul.f32 0.6931472, %v1936_v47  ;;  %1945 = vlog2.f32 %v814_v28  ;;  %v353_v14 = vmul.f32 1.442695, %v338_v57 }
  0x75   : > { %v1938_v52 = vpop.eup %1937  ;;  %1947 = vpow2.f32 %v351_v43  ;;  %v625_v29 = vmul.f32 1.442695, %v610_v7 }
  0x76   : > { %v2469_v55 = vpop.eup %1939  ;;  %v566_v56 = vmul.f32 0.45454547, %v554_v50  ;;  %v472_v10 = vmul.f32 %v1938_v52, %v407_v30  ;;  %vm477_vm3 = vweird.f32 %v1938_v52 }
  0x77   : > { %v1942_v59 = vpop.eup %1941  ;;  %v655_v61 = vmul.f32 2.43, %v2469_v55  ;;  %v631_v12 = vmul.f32 2.51, %v2469_v55  ;;  %vm2481_vm4 = vmor %vm476_vm1, %vm477_vm3 }
  0x78   : > { %v577_v1 = vmul.f32 1.442695, %v566_v56  ;;  %v473_v19 = vsub.f32 1.0, %v472_v10  ;;  %v1944_v3 = vpop.eup %1943  ;;  %v384_v62 = vmul.f32 2.43, %v1942_v59 }
  0x79   : > { %v663_v35 = vadd.f32 0.59, %v655_v61  ;;  %v360_v22 = vmul.f32 2.51, %v1942_v59  ;;  %v632_v24 = vmul.f32 2.51, %v1944_v3 }
  0x7a   : > { %v1946_v8 = vpop.eup %1945  ;;  %1949 = vpow2.f32 %v577_v1  ;;  %v474_v9 = vmul.f32 %v1938_v52, %v473_v19  ;;  %v392_v58 = vadd.f32 0.59, %v384_v62  ;;  %v656_v25 = vmul.f32 2.43, %v1944_v3 }
  0x7b   : > { %v2478_v16 = vpop.eup %1947  ;;  %v826_v13 = vmul.f32 0.6931472, %v1946_v8  ;;  %v671_v11 = vmul.f32 %v2469_v55, %v663_v35  ;;  %1951 = vpow2.f32 %v623_v0  ;;  %v639_v32 = vadd.f32 0.03, %v631_v12 }
  0x7c   : > { %v475_v15 = vadd.f32 %v1938_v52, %v474_v9  ;;  %v400_v27 = vmul.f32 %v1942_v59, %v392_v58  ;;  %v664_v23 = vadd.f32 0.59, %v656_v25  ;;  %v385_v30 = vmul.f32 2.43, %v2478_v16 }
  0x7d   : > { %v838_v18 = vmul.f32 0.45454547, %v826_v13  ;;  %v2486_v26 = vadd.f32 0.14, %v671_v11  ;;  %1953 = vpow2.f32 %v353_v14  ;;  %v368_v36 = vadd.f32 0.03, %v360_v22 }
  0x7e   : > { %v479_v21 = vsel %vm2481_vm4, %v1938_v52, %v475_v15  ;;  %v2496_v38 = vadd.f32 0.14, %v400_v27  ;;  %v640_v40 = vadd.f32 0.03, %v632_v24  ;;  %v672_v42 = vmul.f32 %v1944_v3, %v664_v23 }
  0x7f   : > { %v849_v31 = vmul.f32 1.442695, %v838_v18  ;;  %v484_v4 = vsel %vm2471_vm2, %v483_v2, %v479_v21  ;;  %1955 = vrcp.f32 %v2486_v26  ;;  %v361_v43 = vmul.f32 2.51, %v2478_v16 }
  0x80   : > { %v2494_v33 = vpop.eup %1949  ;;  %v485_v34 = vmul.f32 %v484_v4, %v375_v5  ;;  %v393_v44 = vadd.f32 0.59, %v385_v30  ;;  %v752_v46 = vand.u32 2147483647, %v2486_v26  ;;  %v754_v47 = vand.u32 2147483648, %v2486_v26 }
  0x81   : > { %v2498_v41 = vpop.eup %1951  ;;  %1726 = vmatmul.msk.f32.gmra.mxu0 %vm290_vm8, %v2494_v33  ;;  %1957 = vpow2.f32 %v849_v31  ;;  %v2506_v48 = vadd.f32 0.14, %v672_v42  ;;  %v647_v6 = vmul.f32 %v2469_v55, %v639_v32  ;;  %v2511_v52 = vmul.f32 %v1942_v59, %v368_v36 }
  0x82   : > { %v535_v28 = vmax.f32 %v485_v34, 0.0  ;;  %1959 = vrcp.f32 %v2496_v38  ;;  %v401_v53 = vmul.f32 %v2478_v16, %v393_v44  ;;  %vm748_vm5 = vweird.f32 %v2486_v26 }
  0x83   : > { %1961 = vpow2.f32 %v625_v29  ;;  %v2508_v49 = vpop.eup %1953  ;;  %v2515_v56 = vmul.f32 %v1944_v3, %v640_v40  ;;  %v2518_v10 = vadd.f32 0.03, %v361_v43  ;;  %v495_v60 = vand.u32 2147483647, %v2496_v38 }
  0x84   : > { %v543_v50 = vmin.f32 %v535_v28, 1.0  ;;  %1963 = vrcp.f32 %v2506_v48  ;;  %v497_v55 = vand.u32 2147483648, %v2496_v38  ;;  %vm2525_vm6 = vcmp.eq.f32.partialorder %v752_v46, 8.507059e+37 }
  0x85   : > { %v1956_v54 = vpop.eup %1955  ;;  %v755_v0 = vor.u32 1.1754944e-38, %v754_v47  ;;  %v767_v1 = vand.u32 2147483647, %v2506_v48  ;;  %v2530_v19 = vadd.f32 0.14, %v401_v53  ;;  %v769_v5 = vand.u32 2147483648, %v2506_v48 }
  0x86   : > { %1965 = vlog2.f32 %v543_v50  ;;  %v744_v57 = vmul.f32 %v1956_v54, %v2486_v26  ;;  %vm749_vm7 = vweird.f32 %v1956_v54  ;;  %v657_v35 = vmul.f32 2.43, %v2498_v41 }
  0x87   : > { %v2523_v59 = vpop.eup %1957  ;;  %vm491_vm9 = vweird.f32 %v2496_v38  ;;  %1967 = vrcp.f32 %v2530_v19  ;;  %v633_v8 = vmul.f32 2.51, %v2498_v41  ;;  %vm2542_vm10 = vcmp.eq.f32.partialorder %v495_v60, 8.507059e+37  ;;  %vm2549_vm12 = vmor %vm748_vm5, %vm749_vm7 }
  0x88   : > { %v1960_v2 = vpop.eup %1959  ;;  %1738 = vmatmul.msk.f32.gmra.mxu2 %vm290_vm8, %v2523_v59  ;;  %v745_v3 = vsub.f32 1.0, %v744_v57  ;;  %v498_v14 = vor.u32 1.1754944e-38, %v497_v55  ;;  %vm763_vm11 = vweird.f32 %v2506_v48  ;;  %vm2553_vm14 = vcmp.eq.f32.partialorder %v767_v1, 8.507059e+37 }
  0x89   : > { %v2536_v62 = vpop.eup %1961  ;;  %v487_v7 = vmul.f32 %v1960_v2, %v2496_v38  ;;  %vm492_vm13 = vweird.f32 %v1960_v2  ;;  %v665_v15 = vadd.f32 0.59, %v657_v35  ;;  %v770_v18 = vor.u32 1.1754944e-38, %v769_v5 }
  0x8a   : > { %v746_v9 = vmul.f32 %v1956_v54, %v745_v3  ;;  %v1964_v13 = vpop.eup %1963  ;;  %vm506_vm15 = vweird.f32 %v2530_v19  ;;  %v510_v29 = vand.u32 2147483647, %v2530_v19  ;;  %vm2565_vm0 = vmor %vm491_vm9, %vm492_vm13  ;;  %v512_v4 = vand.u32 2147483648, %v2530_v19 }
  0x8b   : > { %v488_v11 = vsub.f32 1.0, %v487_v7  ;;  %v759_v25 = vmul.f32 %v1964_v13, %v2506_v48  ;;  %v673_v21 = vmul.f32 %v2498_v41, %v665_v15  ;;  %vm764_vm1 = vweird.f32 %v1964_v13 }
  0x8c   : > { %v1966_v22 = vpop.eup %1965  ;;  %v747_v24 = vadd.f32 %v1956_v54, %v746_v9  ;;  %v386_v28 = vmul.f32 2.43, %v2508_v49  ;;  %vm2580_vm2 = vmor %vm763_vm11, %vm764_vm1  ;;  %v377_v55 = vmul.f32 %v2478_v16, %v2518_v10  ;;  %v641_v48 = vadd.f32 0.03, %v633_v8 }
  0x8d   : > { %v556_v27 = vmul.f32 0.6931472, %v1966_v22  ;;  %v489_v26 = vmul.f32 %v1960_v2, %v488_v11  ;;  %v760_v31 = vsub.f32 1.0, %v759_v25  ;;  %v1968_v32 = vpop.eup %1967  ;;  %v2572_v42 = vadd.f32 0.14, %v673_v21 }
  0x8e   : > { %v751_v23 = vsel %vm2549_vm12, %v1956_v54, %v747_v24  ;;  %v502_v38 = vmul.f32 %v1968_v32, %v2530_v19  ;;  %vm507_vm3 = vweird.f32 %v1968_v32  ;;  %vm2601_vm5 = vcmp.eq.f32.partialorder %v510_v29, 8.507059e+37 }
  0x8f   : > { %v567_v34 = vmul.f32 0.45454547, %v556_v27  ;;  %v756_v36 = vsel %vm2525_vm6, %v755_v0, %v751_v23  ;;  %v490_v40 = vadd.f32 %v1960_v2, %v489_v26  ;;  %v761_v44 = vmul.f32 %v1964_v13, %v760_v31  ;;  %vm2597_vm4 = vmor %vm506_vm15, %vm507_vm3 }
  0x90   : > { %v757_v43 = vmul.f32 %v756_v36, %v647_v6  ;;  %1969 = vrcp.f32 %v2572_v42  ;;  %v503_v57 = vsub.f32 1.0, %v502_v38  ;;  %vm778_vm6 = vweird.f32 %v2572_v42 }
  0x91   : > { %v579_v46 = vmul.f32 1.442695, %v567_v34  ;;  %v494_v47 = vsel %vm2565_vm0, %v1960_v2, %v490_v40  ;;  %v762_v54 = vadd.f32 %v1964_v13, %v761_v44  ;;  %v394_v2 = vadd.f32 0.59, %v386_v28 }
  0x92   : > { %v807_v53 = vmax.f32 %v757_v43, 0.0  ;;  %v499_v6 = vsel %vm2542_vm10, %v498_v14, %v494_v47  ;;  %v504_v1 = vmul.f32 %v1968_v32, %v503_v57  ;;  %v782_v19 = vand.u32 2147483647, %v2572_v42 }
  0x93   : > { %1971 = vpow2.f32 %v579_v46  ;;  %v500_v60 = vmul.f32 %v499_v6, %v2511_v52  ;;  %v766_v0 = vsel %vm2580_vm2, %v1964_v13, %v762_v54  ;;  %v513_v52 = vor.u32 1.1754944e-38, %v512_v4 }
  0x94   : > { %v815_v61 = vmin.f32 %v807_v53, 1.0  ;;  %v771_v5 = vsel %vm2553_vm14, %v770_v18, %v766_v0  ;;  %v505_v7 = vadd.f32 %v1968_v32, %v504_v1  ;;  %v402_v8 = vmul.f32 %v2508_v49, %v394_v2 }
  0x95   : > { %v536_v3 = vmax.f32 %v500_v60, 0.0  ;;  %v772_v10 = vmul.f32 %v771_v5, %v2515_v56  ;;  %v658_v14 = vmul.f32 2.43, %v2536_v62  ;;  %v784_v58 = vand.u32 2147483648, %v2572_v42 }
  0x96   : > { %1973 = vlog2.f32 %v815_v61  ;;  %v1970_v9 = vpop.eup %1969  ;;  %v509_v20 = vsel %vm2597_vm4, %v1968_v32, %v505_v7  ;;  %v410_v22 = vadd.f32 0.14, %v402_v8  ;;  %v362_v23 = vmul.f32 2.51, %v2508_v49 }
  0x97   : > { %v544_v12 = vmin.f32 %v536_v3, 1.0  ;;  %v808_v13 = vmax.f32 %v772_v10, 0.0  ;;  %v774_v11 = vmul.f32 %v1970_v9, %v2572_v42  ;;  %v514_v15 = vsel %vm2601_vm5, %v513_v52, %v509_v20 }
  0x98   : > { %vm779_vm7 = vweird.f32 %v1970_v9  ;;  %v515_v25 = vmul.f32 %v514_v15, %v377_v55  ;;  %v666_v27 = vadd.f32 0.59, %v658_v14  ;;  %v785_v4 = vor.u32 1.1754944e-38, %v784_v58 }
  0x99   : > { %v2614_v56 = vpop.eup %1971  ;;  %1975 = vlog2.f32 %v544_v12  ;;  %v816_v24 = vmin.f32 %v808_v13, 1.0  ;;  %v775_v18 = vsub.f32 1.0, %v774_v11  ;;  %vm2623_vm9 = vmor %vm778_vm6, %vm779_vm7  ;;  %v649_v36 = vmul.f32 %v2498_v41, %v641_v48 }
  0x9a   : > { %1727 = vmatmul.msk.f32.gmra.mxu0 %vm290_vm8, %v2614_v56  ;;  %1977 = vrcp.f32 %v410_v22  ;;  %v537_v29 = vmax.f32 %v515_v25, 0.0  ;;  %v674_v32 = vmul.f32 %v2536_v62, %v666_v27  ;;  %vm783_vm10 = vcmp.eq.f32.partialorder %v782_v19, 8.507059e+37 }
  0x9b   : > { %1979 = vlog2.f32 %v816_v24  ;;  %v776_v21 = vmul.f32 %v1970_v9, %v775_v18  ;;  %v370_v46 = vadd.f32 0.03, %v362_v23  ;;  %v634_v6 = vmul.f32 2.51, %v2536_v62 }
  0x9c   : > { %v1974_v26 = vpop.eup %1973  ;;  %v545_v34 = vmin.f32 %v537_v29, 1.0  ;;  %v682_v38 = vadd.f32 0.14, %v674_v32  ;;  %vm521_vm11 = vweird.f32 %v410_v22  ;;  %v525_v48 = vand.u32 2147483647, %v410_v22 }
  0x9d   : > { %v828_v30 = vmul.f32 0.6931472, %v1974_v26  ;;  %v777_v40 = vadd.f32 %v1970_v9, %v776_v21  ;;  %v527_v61 = vand.u32 2147483648, %v410_v22  ;;  %v642_v52 = vadd.f32 0.03, %v634_v6 }
  0x9e   : > { %1981 = vlog2.f32 %v545_v34  ;;  %vm526_vm14 = vcmp.eq.f32.partialorder %v525_v48, 8.507059e+37  ;;  %vm793_vm15 = vweird.f32 %v682_v38  ;;  %v799_v58 = vand.u32 2147483648, %v682_v38 }
  0x9f   : > { %v1976_v43 = vpop.eup %1975  ;;  %v839_v44 = vmul.f32 0.45454547, %v828_v30  ;;  %v781_v42 = vsel %vm2623_vm9, %v1970_v9, %v777_v40  ;;  %1983 = vrcp.f32 %v682_v38  ;;  %v378_v9 = vmul.f32 %v2508_v49, %v370_v46 }
  0xa0   : > { %v558_v28 = vmul.f32 0.6931472, %v1976_v43  ;;  %v1978_v47 = vpop.eup %1977  ;;  %v786_v53 = vsel %vm783_vm10, %v785_v4, %v781_v42  ;;  %v528_v19 = vor.u32 1.1754944e-38, %v527_v61  ;;  %v800_v29 = vor.u32 1.1754944e-38, %v799_v58 }
  0xa1   : > { %v851_v50 = vmul.f32 1.442695, %v839_v44  ;;  %v1980_v54 = vpop.eup %1979  ;;  %v787_v41 = vmul.f32 %v786_v53, %v649_v36  ;;  %v517_v60 = vmul.f32 %v1978_v47, %v410_v22  ;;  %vm522_vm12 = vweird.f32 %v1978_v47 }
  0xa2   : > { %v568_v57 = vmul.f32 0.45454547, %v558_v28  ;;  %v830_v55 = vmul.f32 0.6931472, %v1980_v54  ;;  %vm2634_vm13 = vmor %vm521_vm11, %vm522_vm12  ;;  %v797_v22 = vand.u32 2147483647, %v682_v38  ;;  %v650_v30 = vmul.f32 %v2536_v62, %v642_v52 }
  0xa3   : > { %1985 = vpow2.f32 %v851_v50  ;;  %v809_v1 = vmax.f32 %v787_v41, 0.0  ;;  %v518_v2 = vsub.f32 1.0, %v517_v60  ;;  %v1168_v48 = vmul.f32 %v2402_v39, %v2402_v39 }
  0xa4   : > { %v581_v0 = vmul.f32 1.442695, %v568_v57  ;;  %v840_v3 = vmul.f32 0.45454547, %v830_v55  ;;  %v1982_v5 = vpop.eup %1981  ;;  %vm798_vm2 = vcmp.eq.f32.partialorder %v797_v22, 8.507059e+37  ;;  %vm930_vm3 = vcmask 523264  }
  0xa5   : > { %v817_v35 = vmin.f32 %v809_v1, 1.0  ;;  %v519_v16 = vmul.f32 %v1978_v47, %v518_v2  ;;  %v1984_v10 = vpop.eup %1983  ;;  %v560_v8 = vmul.f32 0.6931472, %v1982_v5  ;;  %v1170_v1 = vmul.f32 %v2465_v45, %v2465_v45 }
  0xa6   : > { %1987 = vpow2.f32 %v581_v0  ;;  %v853_v7 = vmul.f32 1.442695, %v840_v3  ;;  %v789_v13 = vmul.f32 %v1984_v10, %v682_v38  ;;  %vm794_vm0 = vweird.f32 %v1984_v10 }
  0xa7   : > { %1989 = vlog2.f32 %v817_v35  ;;  %v520_v14 = vadd.f32 %v1978_v47, %v519_v16  ;;  %v569_v11 = vmul.f32 0.45454547, %v560_v8  ;;  %vm795_vm1 = vmor %vm793_vm15, %vm794_vm0  ;;  %v1169_v0 = vmul.f32 %v2436_v63, %v2436_v63 }
  0xa8   : > { %1991 = vpow2.f32 %v853_v7  ;;  %v790_v15 = vsub.f32 1.0, %v789_v13  ;;  %v1171_v2 = vmul.f32 %v2523_v59, %v2523_v59 }
  0xa9   : > { %v2638_v20 = vpop.eup %1985  ;;  %v524_v49 = vsel %vm2634_vm13, %v1978_v47, %v520_v14  ;;  %v583_v24 = vmul.f32 1.442695, %v569_v11 }
  0xaa   : > { %1739 = vmatmul.msk.f32.gmra.mxu2 %vm290_vm8, %v2638_v20  ;;  %v529_v25 = vsel %vm526_vm14, %v528_v19, %v524_v49  ;;  %v791_v26 = vmul.f32 %v1984_v10, %v790_v15  ;;  %v1172_v3 = vmul.f32 %v2638_v20, %v2638_v20 }
  0xab   : > { %v530_v27 = vmul.f32 %v529_v25, %v378_v9  ;;  %1993 = vpow2.f32 %v583_v24 }
  0xac   : > { %v2644_v18 = vpop.eup %1987  ;;  %v792_v31 = vadd.f32 %v1984_v10, %v791_v26  ;;  %v2696_v26 = vld [vmem:[%s3029_s3] sm:$0xff] }
  0xad   : > { %1728 = vmatmul.msk.f32.gmra.mxu0 %vm290_vm8, %v2644_v18  ;;  %v1990_v21 = vpop.eup %1989  ;;  %v538_v23 = vmax.f32 %v530_v27, 0.0 }
  0xae   : > { %v2649_v4 = vpop.eup %1991  ;;  %v832_v32 = vmul.f32 0.6931472, %v1990_v21  ;;  %v796_v36 = vsel %vm795_vm1, %v1984_v10, %v792_v31  ;;  %v2703_v21 = vld [vmem:[%s3029_s3 + $0x8] sm:$0xff] }
  0xaf   : > { %v546_v34 = vmin.f32 %v538_v23, 1.0  ;;  %v801_v43 = vsel %vm798_vm2, %v800_v29, %v796_v36  ;;  %v1173_v5 = vmul.f32 %v2649_v4, %v2649_v4  ;;  %v2730_v36 = vld [vmem:[%s3028_s2] sm:$0xff] }
  0xb0   : > { %v841_v40 = vmul.f32 0.45454547, %v832_v32  ;;  %v802_v44 = vmul.f32 %v801_v43, %v650_v30  ;;  %v2710_v30 = vld [vmem:[%s3029_s3 + $0x10] sm:$0xff]  ;;  %v2719_v32 = vld [vmem:[%s3029_s3 + $0x18] sm:$0xff] }
  0xb1   : > { %1995 = vlog2.f32 %v546_v34  ;;  %v2653_v38 = vpop.eup %1993  ;;  %v2724_v34 = vld [vmem:[%s3028_s2 + $0x8] sm:$0xff] }
  0xb2   : > { %1740 = vmatmul.msk.f32.gmra.mxu2 %vm290_vm8, %v2649_v4  ;;  %v855_v28 = vmul.f32 1.442695, %v841_v40  ;;  %v810_v42 = vmax.f32 %v802_v44, 0.0 }
  0xb4   : > { %1997 = vpow2.f32 %v855_v28  ;;  %v818_v62 = vmin.f32 %v810_v42, 1.0  ;;  %v1066_v28 = vmul.f32 %v2399_v17, %v2399_v17 }
  0xb5   : > { %1729 = vmatmul.msk.f32.gmra.mxu0 %vm290_vm8, %v2653_v38 }
  0xb6   : > { %1999 = vlog2.f32 %v818_v62  ;;  %v1067_v62 = vmul.f32 %v2423_v51, %v2423_v51 }
  0xb7   : > { %v1996_v46 = vpop.eup %1995 }
  0xb8   : > { %v562_v47 = vmul.f32 0.6931472, %v1996_v46  ;;  %v1068_v46 = vmul.f32 %v2460_v37, %v2460_v37 }
  0xba   : > { %v2657_v50 = vpop.eup %1997  ;;  %v570_v53 = vmul.f32 0.45454547, %v562_v47  ;;  %v1069_v47 = vmul.f32 %v2494_v33, %v2494_v33 }
  0xbb   : > { %1741 = vmatmul.msk.f32.gmra.mxu2 %vm290_vm8, %v2657_v50  ;;  %v1174_v35 = vmul.f32 %v2657_v50, %v2657_v50 }
  0xbc   : > { %v585_v6 = vmul.f32 1.442695, %v570_v53  ;;  %v2000_v54 = vpop.eup %1999  ;;  %v1070_v53 = vmul.f32 %v2614_v56, %v2614_v56 }
  0xbd   : > { %v834_v57 = vmul.f32 0.6931472, %v2000_v54  ;;  %v1072_v54 = vmul.f32 %v2653_v38, %v2653_v38 }
  0xbe   : > { %2001 = vpow2.f32 %v585_v6  ;;  %v1071_v6 = vmul.f32 %v2644_v18, %v2644_v18 }
  0xbf   : > { %v842_v41 = vmul.f32 0.45454547, %v834_v57 }
  0xc1   : > { %v857_v60 = vmul.f32 1.442695, %v842_v41 }
  0xc3   : > { %2003 = vpow2.f32 %v857_v60 }
  0xc4   : > { %v2661_v55 = vpop.eup %2001 }
  0xc5   : > { %1730 = vmatmul.msk.f32.gmra.mxu0 %vm290_vm8, %v2661_v55  ;;  %v1073_v57 = vmul.f32 %v2661_v55, %v2661_v55 }
  0xc9   : > { %v2667_v61 = vpop.eup %2003 }
  0xca   : > { %1742 = vmatmul.msk.f32.gmra.mxu2 %vm290_vm8, %v2667_v61  ;;  %v1175_v52 = vmul.f32 %v2667_v61, %v2667_v61 }
  0xcd   : > { %1759 = vmatmul.msk.f32.vlgmr.msrb.gmra.mxu0 %vm290_vm8, %v1168_v48 }
  0xd5   : > { %1760 = vmatmul.msk.f32.gmra.mxu0 %vm290_vm8, %v1169_v0 }
  0xdd   : > { %1761 = vmatmul.msk.f32.gmra.mxu0 %vm290_vm8, %v1170_v1 }
  0xde   : > { %v906_v16 = vpop.f32.mrf.mxu0 }
  0xe5   : > { %1762 = vmatmul.msk.f32.gmra.mxu0 %vm290_vm8, %v1171_v2  ;;  %v1013_v7 = vpop.f32.mrf.mxu2 }
  0xe6   : > { %v909_v10 = vpop.f32.mrf.mxu0 }
  0xed   : > { %1763 = vmatmul.msk.f32.gmra.mxu0 %vm290_vm8, %v1172_v3  ;;  %v1016_v9 = vpop.f32.mrf.mxu2 }
  0xee   : > { %v912_v8 = vpop.f32.mrf.mxu0 }
  0xf5   : > { %1764 = vmatmul.msk.f32.gmra.mxu0 %vm290_vm8, %v1173_v5 }
  0xf6   : > { %v1019_v19 = vpop.f32.mrf.mxu2 }
  0xfd   : > { %1765 = vmatmul.msk.f32.gmra.mxu0 %vm290_vm8, %v1174_v35 }
  0xfe   : > { %v915_v12 = vpop.f32.mrf.mxu0 }
 0x105   : > { %1766 = vmatmul.msk.f32.gmra.mxu0 %vm290_vm8, %v1175_v52 }
 0x10b   : > { %v1022_v13 = vpop.f32.mrf.mxu2 }
 0x117   : > { %v918_v14 = vpop.f32.mrf.mxu0 }
 0x12a   : > { %v921_v11 = vpop.f32.mrf.mxu0 }
 0x12d   : > { %v1025_v58 = vpop.f32.mrf.mxu2 }
 0x132   : > { %v924_v49 = vpop.f32.mrf.mxu0 }
 0x135   : > { %v1028_v15 = vpop.f32.mrf.mxu2 }
 0x13e   : > { %v1031_v24 = vpop.f32.mrf.mxu2 }
 0x142   : > { %v927_v22 = vpop.f32.mrf.mxu0 }
 0x143   : > { %951 = vmatpush.msra.mxu1 %v927_v22 }
 0x145   : > { %952 = vmatpush.msra.mxu1 %v924_v49 }
 0x147   : > { %953 = vmatpush.msra.mxu1 %v921_v11 }
 0x149   : > { %954 = vmatpush.msra.mxu1 %v918_v14 }
 0x14a   : > { %v1217_v25 = vpop.f32.mrf.mxu0 }
 0x14b   : > { %955 = vmatpush.msra.mxu1 %v915_v12 }
 0x14d   : > { %956 = vmatpush.msra.mxu1 %v912_v8  ;;  %v1034_v27 = vpop.f32.mrf.mxu2 }
 0x14e   : > { %1789 = vmatpush.msra.mxu3 %v1034_v27 }
 0x14f   : > { %957 = vmatpush.msra.mxu1 %v909_v10 }
 0x150   : > { %1790 = vmatpush.msra.mxu3 %v1031_v24 }
 0x151   : > { %958 = vmatpush.msra.mxu1 %v906_v16 }
 0x152   : > { %1731 = vmatmul.msk.f32.vlgmr.msra.gmra.mxu1 %vm930_vm3, %v2696_v26  ;;  %v1220_v29 = vpop.f32.mrf.mxu0  ;;  %1791 = vmatpush.msra.mxu3 %v1028_v15 }
 0x153   : > { %1045 = vmatpush.msrb.mxu1 %v1034_v27 }
 0x154   : > { %1792 = vmatpush.msra.mxu3 %v1025_v58 }
 0x155   : > { %1046 = vmatpush.msrb.mxu1 %v1031_v24 }
 0x156   : > { %1793 = vmatpush.msra.mxu3 %v1022_v13 }
 0x157   : > { %1047 = vmatpush.msrb.mxu1 %v1028_v15 }
 0x158   : > { %1794 = vmatpush.msra.mxu3 %v1019_v19 }
 0x159   : > { %1048 = vmatpush.msrb.mxu1 %v1025_v58 }
 0x15a   : > { %1732 = vmatmul.msk.f32.gmra.mxu1 %vm930_vm3, %v2703_v21  ;;  %v1223_v23 = vpop.f32.mrf.mxu0  ;;  %1795 = vmatpush.msra.mxu3 %v1016_v9 }
 0x15b   : > { %1049 = vmatpush.msrb.mxu1 %v1022_v13 }
 0x15c   : > { %1796 = vmatpush.msra.mxu3 %v1013_v7 }
 0x15d   : > { %1050 = vmatpush.msrb.mxu1 %v1019_v19  ;;  %1745 = vmatmul.msk.f32.vlgmr.msra.gmra.mxu3 %vm930_vm3, %v2710_v30 }
 0x15f   : > { %1051 = vmatpush.msrb.mxu1 %v1016_v9 }
 0x161   : > { %1052 = vmatpush.msrb.mxu1 %v1013_v7 }
 0x162   : > { %1733 = vmatmul.msk.f32.gmra.mxu1 %vm930_vm3, %v2710_v30  ;;  %v1226_v31 = vpop.f32.mrf.mxu0 }
 0x163   : > { %1112 = vmatpush.msra.mxu1 %v2724_v34 }
 0x165   : > { %1113 = vmatpush.msra.mxu1 %v2730_v36  ;;  %1746 = vmatmul.msk.f32.gmra.mxu3 %vm930_vm3, %v2719_v32 }
 0x16a   : > { %1734 = vmatmul.msk.f32.gmra.mxu1 %vm930_vm3, %v2719_v32  ;;  %v1229_v40 = vpop.f32.mrf.mxu0 }
 0x172   : > { %1743 = vmatmul.msk.f32.vlgmr.msrb.gmra.mxu1 %vm930_vm3, %v2696_v26  ;;  %v1232_v43 = vpop.f32.mrf.mxu0 }
 0x17a   : > { %1744 = vmatmul.msk.f32.gmra.mxu1 %vm930_vm3, %v2703_v21  ;;  %v1235_v44 = vpop.f32.mrf.mxu0 }
 0x182   : > { %1747 = vmatmul.msk.f32.vlgmr.msra.gmra.mxu1 %vm290_vm8, %v1066_v28  ;;  %v1238_v42 = vpop.f32.mrf.mxu0 }
 0x183   : > { %1249 = vmatpush.msrb.mxu2 %v1238_v42 }
 0x185   : > { %1250 = vmatpush.msrb.mxu2 %v1235_v44 }
 0x187   : > { %1251 = vmatpush.msrb.mxu2 %v1232_v43 }
 0x189   : > { %1252 = vmatpush.msrb.mxu2 %v1229_v40 }
 0x18a   : > { %1748 = vmatmul.msk.f32.gmra.mxu1 %vm290_vm8, %v1067_v62 }
 0x18b   : > { %1253 = vmatpush.msrb.mxu2 %v1226_v31 }
 0x18d   : > { %1254 = vmatpush.msrb.mxu2 %v1223_v23 }
 0x18f   : > { %1255 = vmatpush.msrb.mxu2 %v1220_v29 }
 0x191   : > { %1256 = vmatpush.msrb.mxu2 %v1217_v25 }
 0x192   : > { %1749 = vmatmul.msk.f32.gmra.mxu1 %vm290_vm8, %v1068_v46  ;;  %1767 = vmatmul.msk.f32.vlgmr.msrb.gmra.mxu2 %vm930_vm3, %v2696_v26 }
 0x19a   : > { %1750 = vmatmul.msk.f32.gmra.mxu1 %vm290_vm8, %v1069_v47  ;;  %1768 = vmatmul.msk.f32.gmra.mxu2 %vm930_vm3, %v2703_v21 }
 0x1a2   : > { %1751 = vmatmul.msk.f32.gmra.mxu1 %vm290_vm8, %v1070_v53  ;;  %1769 = vmatmul.msk.f32.gmra.mxu2 %vm930_vm3, %v2710_v30 }
 0x1aa   : > { %1752 = vmatmul.msk.f32.gmra.mxu1 %vm290_vm8, %v1071_v6  ;;  %1770 = vmatmul.msk.f32.gmra.mxu2 %vm930_vm3, %v2719_v32 }
 0x1b2   : > { %1753 = vmatmul.msk.f32.gmra.mxu1 %vm290_vm8, %v1072_v54 }
 0x1ba   : > { %1754 = vmatmul.msk.f32.gmra.mxu1 %vm290_vm8, %v1073_v57 }
 0x1cf   : > { %v960_v41 = vpop.f32.mrf.mxu1 }
 0x1d0   : > { %v1472_v8 = vmul.f32 2.0, %v960_v41  ;;  %v2785_v13 = vmul.f32 %v960_v41, %v960_v41 }
 0x1d7   : > { %v963_v60 = vpop.f32.mrf.mxu1 }
 0x1d8   : > { %v1473_v29 = vmul.f32 2.0, %v963_v60  ;;  %v2791_v31 = vmul.f32 %v963_v60, %v963_v60 }
 0x1df   : > { %v966_v48 = vpop.f32.mrf.mxu1 }
 0x1e0   : > { %v1474_v0 = vmul.f32 2.0, %v966_v48  ;;  %v2773_v1 = vmul.f32 %v966_v48, %v966_v48  ;;  %v1060_v2 = vpop.f32.mrf.mxu3 }
 0x1e1   : > { %v2775_v5 = vmul.f32 %v1060_v2, %v1060_v2  ;;  %v2777_v35 = vmul.f32 %v1060_v2, %v966_v48 }
 0x1e2   : > { %v1478_v3 = vmul.f32 %v1474_v0, %v1060_v2 }
 0x1e3   : > { %v1486_v16 = vadd.f32 %v2775_v5, %v2773_v1 }
 0x1e4   : > { %v1482_v44 = vadd.f32 0.0001, %v1478_v3 }
 0x1e5   : > { %v1490_v52 = vadd.f32 0.0001, %v1486_v16 }
 0x1e7   : > { %v2781_v10 = vpop.f32.mrf.mxu1  ;;  %2005 = vrcp.f32 %v1490_v52  ;;  %v1533_v22 = vand.u32 2147483648, %v1490_v52  ;;  %v1531_v25 = vand.u32 2147483647, %v1490_v52  ;;  %vm1527_vm5 = vweird.f32 %v1490_v52 }
 0x1e9   : > { %v1534_v43 = vor.u32 1.1754944e-38, %v1533_v22  ;;  %vm1532_vm7 = vcmp.eq.f32.partialorder %v1531_v25, 8.507059e+37 }
 0x1ed   : > { %v2006_v7 = vpop.eup %2005 }
 0x1ee   : > { %v1523_v12 = vmul.f32 %v2006_v7, %v1490_v52  ;;  %vm1528_vm4 = vweird.f32 %v2006_v7 }
 0x1ef   : > { %v1054_v9 = vpop.f32.mrf.mxu1  ;;  %vm1529_vm6 = vmor %vm1527_vm5, %vm1528_vm4 }
 0x1f0   : > { %v1476_v19 = vmul.f32 %v1472_v8, %v1054_v9  ;;  %v2783_v14 = vmul.f32 %v1054_v9, %v1054_v9  ;;  %v2787_v11 = vmul.f32 %v1054_v9, %v960_v41  ;;  %v1524_v58 = vsub.f32 1.0, %v1523_v12 }
 0x1f2   : > { %v1484_v49 = vadd.f32 %v2783_v14, %v2785_v13  ;;  %v1525_v15 = vmul.f32 %v2006_v7, %v1524_v58 }
 0x1f4   : > { %v1488_v24 = vadd.f32 0.0001, %v1484_v49  ;;  %v1526_v27 = vadd.f32 %v2006_v7, %v1525_v15 }
 0x1f6   : > { %2007 = vrcp.f32 %v1488_v24  ;;  %v1530_v40 = vsel %vm1529_vm6, %v2006_v7, %v1526_v27  ;;  %v1503_v0 = vand.u32 2147483648, %v1488_v24  ;;  %v1501_v3 = vand.u32 2147483647, %v1488_v24 }
 0x1f7   : > { %v1057_v23 = vpop.f32.mrf.mxu1  ;;  %v1535_v46 = vsel %vm1532_vm7, %v1534_v43, %v1530_v40  ;;  %vm1497_vm10 = vweird.f32 %v1488_v24  ;;  %v1480_v7 = vadd.f32 0.0001, %v1476_v19 }
 0x1f8   : > { %v1477_v28 = vmul.f32 %v1473_v29, %v1057_v23  ;;  %v2793_v42 = vmul.f32 %v1057_v23, %v1057_v23  ;;  %v2795_v62 = vmul.f32 %v1057_v23, %v963_v60  ;;  %v2799_v53 = vmul.f32 %v1535_v46, %v1482_v44 }
 0x1f9   : > { %v1504_v52 = vor.u32 1.1754944e-38, %v1503_v0  ;;  %vm1502_vm12 = vcmp.eq.f32.partialorder %v1501_v3, 8.507059e+37 }
 0x1fa   : > { %v1485_v47 = vadd.f32 %v2793_v42, %v2791_v31  ;;  %v1481_v23 = vadd.f32 0.0001, %v1477_v28  ;;  %v1270_v28 = vmul.f32 %v2402_v39, %v2399_v17  ;;  %v1274_v17 = vmul.f32 %v2638_v20, %v2614_v56 }
 0x1fb   : > { %v1275_v39 = vmul.f32 %v2649_v4, %v2644_v18 }
 0x1fc   : > { %v2008_v6 = vpop.eup %2007  ;;  %v1489_v54 = vadd.f32 0.0001, %v1485_v47 }
 0x1fd   : > { %v1493_v57 = vmul.f32 %v2008_v6, %v1488_v24  ;;  %vm1498_vm9 = vweird.f32 %v2008_v6 }
 0x1fe   : > { %2009 = vrcp.f32 %v1489_v54  ;;  %vm1499_vm11 = vmor %vm1497_vm10, %vm1498_vm9  ;;  %v1518_v22 = vand.u32 2147483648, %v1489_v54  ;;  %v1516_v27 = vand.u32 2147483647, %v1489_v54  ;;  %vm1512_vm14 = vweird.f32 %v1489_v54 }
 0x1ff   : > { %v1115_v41 = vpop.f32.mrf.mxu1  ;;  %v1494_v48 = vsub.f32 1.0, %v1493_v57 }
 0x200   : > { %v1519_v24 = vor.u32 1.1754944e-38, %v1518_v22  ;;  %vm1517_vm0 = vcmp.eq.f32.partialorder %v1516_v27, 8.507059e+37  ;;  %v2025_v22 = vld [vmem:[%s2223_s14 + $0x8] sm:$0xff]  ;;  %v2028_v27 = vld [vmem:[%s2228_s17 + $0x10] sm:$0xff] }
 0x201   : > { %v1495_v2 = vmul.f32 %v2008_v6, %v1494_v48 }
 0x203   : > { %v1496_v16 = vadd.f32 %v2008_v6, %v1495_v2 }
 0x204   : > { %v2010_v60 = vpop.eup %2009 }
 0x205   : > { %v1508_v8 = vmul.f32 %v2010_v60, %v1489_v54  ;;  %v1500_v9 = vsel %vm1499_vm11, %v2008_v6, %v1496_v16  ;;  %vm1513_vm13 = vweird.f32 %v2010_v60  ;;  %v1271_v54 = vmul.f32 %v2436_v63, %v2423_v51 }
 0x206   : > { %v1505_v12 = vsel %vm1502_vm12, %v1504_v52, %v1500_v9  ;;  %vm1514_vm15 = vmor %vm1512_vm14, %vm1513_vm13  ;;  %v1276_v51 = vmul.f32 %v2657_v50, %v2653_v38  ;;  %v1277_v63 = vmul.f32 %v2667_v61, %v2661_v55 }
 0x207   : > { %v1118_v58 = vpop.f32.mrf.mxu1  ;;  %v1509_v49 = vsub.f32 1.0, %v1508_v8  ;;  %v2801_v15 = vmul.f32 %v1505_v12, %v1480_v7  ;;  %v2023_v12 = vld [vmem:[%s2223_s14] sm:$0xff] }
 0x209   : > { %v1510_v25 = vmul.f32 %v2010_v60, %v1509_v49 }
 0x20b   : > { %v1511_v29 = vadd.f32 %v2010_v60, %v1510_v25 }
 0x20d   : > { %v1515_v40 = vsel %vm1514_vm15, %v2010_v60, %v1511_v29 }
 0x20e   : > { %v1520_v19 = vsel %vm1517_vm0, %v1519_v24, %v1515_v40  ;;  %v2030_v40 = vld [vmem:[%s2228_s17 + $0x18] sm:$0xff] }
 0x20f   : > { %v1121_v43 = vpop.f32.mrf.mxu1  ;;  %v2803_v44 = vmul.f32 %v1520_v19, %v1481_v23 }
 0x217   : > { %v1124_v46 = vpop.f32.mrf.mxu1 }
 0x21f   : > { %v1127_v47 = vpop.f32.mrf.mxu1 }
 0x227   : > { %v1130_v6 = vpop.f32.mrf.mxu1 }
 0x22f   : > { %v1133_v57 = vpop.f32.mrf.mxu1 }
 0x237   : > { %v1136_v48 = vpop.f32.mrf.mxu1 }
 0x238   : > { %1147 = vmatpush.msrb.mxu3 %v1136_v48  ;;  %v2031_v48 = vld [vmem:[%s2223_s14 + $0x20] sm:$0xff] }
 0x23a   : > { %1148 = vmatpush.msrb.mxu3 %v1133_v57 }
 0x23c   : > { %1149 = vmatpush.msrb.mxu3 %v1130_v6 }
 0x23e   : > { %1150 = vmatpush.msrb.mxu3 %v1127_v47 }
 0x240   : > { %1151 = vmatpush.msrb.mxu3 %v1124_v46 }
 0x242   : > { %1152 = vmatpush.msrb.mxu3 %v1121_v43 }
 0x244   : > { %1153 = vmatpush.msrb.mxu3 %v1118_v58  ;;  %v2024_v58 = vld [vmem:[%s2228_s17] sm:$0xff] }
 0x245   : > { %v274_v49 = vsub.f32 %v2023_v12, %v2024_v58 }
 0x246   : > { %1154 = vmatpush.msrb.mxu3 %v1115_v41 }
 0x247   : > { %1755 = vmatmul.msk.f32.vlgmr.msrb.gmra.mxu3 %vm930_vm3, %v2696_v26  ;;  %v282_v29 = vmul.f32 %v274_v49, %v274_v49 }
 0x248   : > { %1316 = vmatpush.msra.mxu3 %v2724_v34  ;;  %v1272_v34 = vmul.f32 %v2465_v45, %v2460_v37  ;;  %v2839_v37 = vpop.f32.mrf.mxu3  ;;  %v1258_v45 = vpop.f32.mrf.mxu2 }
 0x249   : > { %v291_v46 = vsel %vm290_vm8, %v282_v29, 0.0 }
 0x24a   : > { %1317 = vmatpush.msra.mxu3 %v2730_v36  ;;  %v1273_v36 = vmul.f32 %v2523_v59, %v2494_v33  ;;  %v1384_v59 = vsub.f32 %v1258_v45, %v2783_v14  ;;  %v2851_v14 = vmul.f32 %v2781_v10, %v2781_v10 }
 0x24f   : > { %1756 = vmatmul.msk.f32.gmra.mxu3 %vm930_vm3, %v2703_v21 }
 0x250   : > { %v1261_v18 = vpop.f32.mrf.mxu2 }
 0x251   : > { %v1385_v38 = vsub.f32 %v1261_v18, %v2793_v42  ;;  %v2035_v18 = vld [vmem:[%s2223_s14 + $0x30] sm:$0xff] }
 0x257   : > { %1757 = vmatmul.msk.f32.gmra.mxu3 %vm930_vm3, %v2710_v30 }
 0x258   : > { %v1264_v0 = vpop.f32.mrf.mxu2 }
 0x259   : > { %v1386_v61 = vsub.f32 %v1264_v0, %v2775_v5 }
 0x25f   : > { %1758 = vmatmul.msk.f32.gmra.mxu3 %vm930_vm3, %v2719_v32 }
 0x260   : > { %v1267_v0 = vpop.f32.mrf.mxu2 }
 0x267   : > { %1771 = vmatmul.msk.f32.vlgmr.msra.gmra.mxu3 %vm290_vm8, %v1270_v28  ;;  %v2032_v28 = vld [vmem:[%s2228_s17 + $0x20] sm:$0xff] }
 0x26f   : > { %1772 = vmatmul.msk.f32.gmra.mxu3 %vm290_vm8, %v1271_v54  ;;  %v278_v54 = vsub.f32 %v2031_v48, %v2032_v28 }
 0x271   : > { %v286_v45 = vmul.f32 %v278_v54, %v278_v54 }
 0x277   : > { %1773 = vmatmul.msk.f32.gmra.mxu3 %vm290_vm8, %v1272_v34 }
 0x27f   : > { %1774 = vmatmul.msk.f32.gmra.mxu3 %vm290_vm8, %v1273_v36 }
 0x287   : > { %1775 = vmatmul.msk.f32.gmra.mxu3 %vm290_vm8, %v1274_v17 }
 0x28f   : > { %1776 = vmatmul.msk.f32.gmra.mxu3 %vm290_vm8, %v1275_v39  ;;  %v2033_v39 = vld [vmem:[%s2223_s14 + $0x28] sm:$0xff] }
 0x297   : > { %1777 = vmatmul.msk.f32.gmra.mxu3 %vm290_vm8, %v1276_v51  ;;  %v2034_v51 = vld [vmem:[%s2228_s17 + $0x28] sm:$0xff] }
 0x29f   : > { %1778 = vmatmul.msk.f32.gmra.mxu3 %vm290_vm8, %v1277_v63  ;;  %v279_v63 = vsub.f32 %v2033_v39, %v2034_v51 }
 0x2ca   : > { %v1156_v33 = vpop.f32.mrf.mxu3 }
 0x2cb   : > { %v1376_v56 = vsub.f32 %v1156_v33, %v2785_v13 }
 0x2cd   : > { %v1404_v20 = vadd.f32 %v1384_v59, %v1376_v56  ;;  %v1383_v59 = vmul.f32 %v2839_v37, %v2839_v37 }
 0x2cf   : > { %v2865_v9 = vadd.f32 0.0009, %v1404_v20  ;;  %v1387_v12 = vsub.f32 %v1267_v0, %v1383_v59 }
 0x2d1   : > { %2011 = vrcp.f32 %v2865_v9 }
 0x2d2   : > { %v1159_v4 = vpop.f32.mrf.mxu3 }
 0x2d3   : > { %v1377_v50 = vsub.f32 %v1159_v4, %v2791_v31  ;;  %v2036_v4 = vld [vmem:[%s2228_s17 + $0x30] sm:$0xff] }
 0x2d5   : > { %v1405_v41 = vadd.f32 %v1385_v38, %v1377_v50  ;;  %v280_v38 = vsub.f32 %v2035_v18, %v2036_v4  ;;  %v287_v50 = vmul.f32 %v279_v63, %v279_v63 }
 0x2d7   : > { %v2874_v23 = vadd.f32 0.0009, %v1405_v41  ;;  %v2880_v57 = vpop.eup %2011  ;;  %v298_v41 = vsel %vm290_vm8, %v286_v45, 0.0 }
 0x2d8   : > { %v1413_v56 = vmul.f32 %v2880_v57, %v2865_v9  ;;  %vm1418_vm1 = vweird.f32 %v2880_v57 }
 0x2d9   : > { %2013 = vrcp.f32 %v2874_v23  ;;  %v1438_v63 = vand.u32 2147483648, %v2874_v23  ;;  %vm1432_vm5 = vweird.f32 %v2874_v23 }
 0x2da   : > { %v1162_v55 = vpop.f32.mrf.mxu3 }
 0x2db   : > { %v1378_v2 = vsub.f32 %v1162_v55, %v2773_v1  ;;  %v1439_v4 = vor.u32 1.1754944e-38, %v1438_v63 }
 0x2dd   : > { %v2847_v3 = vadd.f32 %v1386_v61, %v1378_v2  ;;  %v2037_v2 = vld [vmem:[%s2223_s14 + $0x38] sm:$0xff] }
 0x2df   : > { %v2897_v61 = vadd.f32 0.0009, %v2847_v3 }
 0x2e1   : > { %2015 = vrcp.f32 %v2897_v61  ;;  %vm1447_vm10 = vweird.f32 %v2897_v61 }
 0x2e2   : > { %v2853_v13 = vpop.f32.mrf.mxu3 }
 0x2e3   : > { %v1379_v42 = vsub.f32 %v2853_v13, %v2851_v14 }
 0x2e5   : > { %v1407_v3 = vadd.f32 %v1387_v12, %v1379_v42 }
 0x2e7   : > { %v2913_v29 = vadd.f32 0.0009, %v1407_v3 }
 0x2ea   : > { %v1319_v16 = vpop.f32.mrf.mxu3 }
 0x2f2   : > { %v1322_v31 = vpop.f32.mrf.mxu3 }
 0x2fa   : > { %v1325_v60 = vpop.f32.mrf.mxu3 }
 0x302   : > { %v1328_v52 = vpop.f32.mrf.mxu3 }
 0x30a   : > { %v1331_v7 = vpop.f32.mrf.mxu3 }
 0x312   : > { %v1334_v8 = vpop.f32.mrf.mxu3 }
 0x31a   : > { %v1337_v5 = vpop.f32.mrf.mxu3 }
 0x322   : > { %v1340_v1 = vpop.f32.mrf.mxu3 }
 0x323   : > { %1351 = vmatpush.msra.mxu2 %v1340_v1  ;;  %v2014_v1 = vpop.eup %2013 }
 0x324   : > { %v2918_v13 = vpop.eup %2015  ;;  %vm1433_vm4 = vweird.f32 %v2014_v1 }
 0x325   : > { %1352 = vmatpush.msra.mxu2 %v1337_v5  ;;  %vm1434_vm6 = vmor %vm1432_vm5, %vm1433_vm4  ;;  %vm1448_vm9 = vweird.f32 %v2918_v13 }
 0x326   : > { %vm1449_vm11 = vmor %vm1447_vm10, %vm1448_vm9 }
 0x327   : > { %1353 = vmatpush.msra.mxu2 %v1334_v8  ;;  %v1414_v8 = vsub.f32 1.0, %v1413_v56 }
 0x329   : > { %1354 = vmatpush.msra.mxu2 %v1331_v7  ;;  %v1487_v7 = vadd.f32 %v1383_v59, %v2851_v14 }
 0x32b   : > { %1355 = vmatpush.msra.mxu2 %v1328_v52  ;;  %v300_v52 = vsel %vm290_vm8, %v287_v50, 0.0 }
 0x32d   : > { %1356 = vmatpush.msra.mxu2 %v1325_v60  ;;  %v288_v60 = vmul.f32 %v280_v38, %v280_v38 }
 0x32f   : > { %1357 = vmatpush.msra.mxu2 %v1322_v31  ;;  %v302_v49 = vsel %vm290_vm8, %v288_v60, 0.0  ;;  %v1451_v60 = vand.u32 2147483647, %v2897_v61 }
 0x331   : > { %1358 = vmatpush.msra.mxu2 %v1319_v16  ;;  %v2038_v16 = vld [vmem:[%s2228_s17 + $0x38] sm:$0xff]  ;;  %vm1452_vm13 = vcmp.eq.f32.partialorder %v1451_v60, 8.507059e+37 }
 0x332   : > { %1779 = vmatmul.msk.f32.vlgmr.msra.gmra.mxu2 %vm930_vm3, %v2696_v26  ;;  %v2026_v26 = vld [vmem:[%s2228_s17 + $0x8] sm:$0xff]  ;;  %v281_v31 = vsub.f32 %v2037_v2, %v2038_v16 }
 0x333   : > { %v275_v25 = vsub.f32 %v2025_v22, %v2026_v26 }
 0x334   : > { %v289_v58 = vmul.f32 %v281_v31, %v281_v31 }
 0x335   : > { %v283_v24 = vmul.f32 %v275_v25, %v275_v25  ;;  %v1428_v25 = vmul.f32 %v2014_v1, %v2874_v23 }
 0x336   : > { %v304_v26 = vsel %vm290_vm8, %v289_v58, 0.0 }
 0x337   : > { %v292_v47 = vsel %vm290_vm8, %v283_v24, 0.0  ;;  %v1429_v14 = vsub.f32 1.0, %v1428_v25 }
 0x338   : > { %v293_v6 = vadd.f32 %v292_v47, %v291_v46 }
 0x33a   : > { %1780 = vmatmul.msk.f32.gmra.mxu2 %vm930_vm3, %v2703_v21  ;;  %v2027_v21 = vld [vmem:[%s2223_s14 + $0x10] sm:$0xff] }
 0x342   : > { %1781 = vmatmul.msk.f32.gmra.mxu2 %vm930_vm3, %v2710_v30  ;;  %v276_v30 = vsub.f32 %v2027_v21, %v2028_v27  ;;  %v2910_v21 = vadd.f32 0.0001, %v1487_v7  ;;  %v1415_v27 = vmul.f32 %v2880_v57, %v1414_v8 }
 0x344   : > { %v284_v43 = vmul.f32 %v276_v30, %v276_v30  ;;  %2017 = vrcp.f32 %v2910_v21  ;;  %v1416_v24 = vadd.f32 %v2880_v57, %v1415_v27  ;;  %vm1542_vm14 = vweird.f32 %v2910_v21 }
 0x345   : > { %2019 = vrcp.f32 %v2913_v29  ;;  %v1546_v25 = vand.u32 2147483647, %v2910_v21 }
 0x346   : > { %v294_v36 = vsel %vm290_vm8, %v284_v43, 0.0  ;;  %v1443_v43 = vmul.f32 %v2918_v13, %v2897_v61 }
 0x347   : > { %v295_v17 = vadd.f32 %v294_v36, %v293_v6  ;;  %v1430_v6 = vmul.f32 %v2014_v1, %v1429_v14 }
 0x349   : > { %v1431_v36 = vadd.f32 %v2014_v1, %v1430_v6 }
 0x34a   : > { %1782 = vmatmul.msk.f32.gmra.mxu2 %vm930_vm3, %v2719_v32  ;;  %v2029_v32 = vld [vmem:[%s2223_s14 + $0x18] sm:$0xff]  ;;  %v2928_v28 = vpop.eup %2017  ;;  %s2976_s14 = sand.u32 1, %s2125_s19  }
 0x34b   : > { %v277_v19 = vsub.f32 %v2029_v32, %v2030_v40  ;;  %v1423_v32 = vand.u32 2147483648, %v2865_v9  ;;  %v1538_v39 = vmul.f32 %v2928_v28, %v2910_v21  ;;  %vm1543_vm12 = vweird.f32 %v2928_v28  ;;  %s1717_s15 = sshll.u32 %s2976_s14, 3  ;;  %s1575_s6 = scalar_lea.sflag [#allocation3], %s2976_s14 }
 0x34c   : > { %vm2961_vm0 = vmor %vm1542_vm14, %vm1543_vm12  ;;  %s238_s23 = scalar_lea.vmem [#allocation2], %s1717_s15 }
 0x34d   : > { %v285_v34 = vmul.f32 %v277_v19, %v277_v19  ;;  %v1421_v19 = vand.u32 2147483647, %v2865_v9  ;;  %v1424_v48 = vor.u32 1.1754944e-38, %v1423_v32  ;;  %v1539_v38 = vsub.f32 1.0, %v1538_v39  ;;  %s1592_s25 = sshll.u32 %s238_s23, 4  ;;  %s1593_s25 = int_to_ptr.vmem [resolvable:$true] %s1592_s25 }
 0x34f   : > { %v296_v33 = vsel %vm290_vm8, %v285_v34, 0.0  ;;  %vm1417_vm8 = vweird.f32 %v2865_v9  ;;  %vm1422_vm3 = vcmp.eq.f32.partialorder %v1421_v19, 8.507059e+37  ;;  %v1444_v9 = vsub.f32 1.0, %v1443_v43 }
 0x350   : > { %v297_v20 = vadd.f32 %v296_v33, %v295_v17  ;;  %vm1419_vm2 = vmor %vm1417_vm8, %vm1418_vm1  ;;  %v2930_v17 = vpop.eup %2019  ;;  %v1436_v33 = vand.u32 2147483647, %v2874_v23  ;;  %v1540_v2 = vmul.f32 %v2928_v28, %v1539_v38  ;;  %vm1462_vm1 = vweird.f32 %v2913_v29 }
 0x351   : > { %v1420_v47 = vsel %vm1419_vm2, %v2880_v57, %v1416_v24  ;;  %v1458_v59 = vmul.f32 %v2930_v17, %v2913_v29  ;;  %v1445_v18 = vmul.f32 %v2918_v13, %v1444_v9  ;;  %vm1463_vm15 = vweird.f32 %v2930_v17 }
 0x352   : > { %v299_v55 = vadd.f32 %v298_v41, %v297_v20  ;;  %v1435_v20 = vsel %vm1434_vm6, %v2014_v1, %v1431_v36  ;;  %vm1437_vm7 = vcmp.eq.f32.partialorder %v1436_v33, 8.507059e+37  ;;  %v1475_v1 = vmul.f32 2.0, %v2781_v10  ;;  %vm1464_vm8 = vmor %vm1462_vm1, %vm1463_vm15 }
 0x353   : > { %v1440_v41 = vsel %vm1437_vm7, %v1439_v4, %v1435_v20  ;;  %v1459_v0 = vsub.f32 1.0, %v1458_v59  ;;  %v1541_v58 = vadd.f32 %v2928_v28, %v1540_v2  ;;  %vm1547_vm2 = vcmp.eq.f32.partialorder %v1546_v25, 8.507059e+37 }
 0x354   : > { %v301_v5 = vadd.f32 %v300_v52, %v299_v55  ;;  %v1453_v55 = vand.u32 2147483648, %v2897_v61  ;;  %v1391_v61 = vmul.f32 %v2839_v37, %v2781_v10  ;;  %v1479_v27 = vmul.f32 %v1475_v1, %v2839_v37 }
 0x355   : > { %v1460_v8 = vmul.f32 %v2930_v17, %v1459_v0  ;;  %v1468_v10 = vand.u32 2147483648, %v2913_v29  ;;  %v1545_v24 = vsel %vm2961_vm0, %v2928_v28, %v1541_v58 }
 0x356   : > { %v303_v22 = vadd.f32 %v302_v49, %v301_v5  ;;  %v1454_v12 = vor.u32 1.1754944e-38, %v1453_v55  ;;  %v1548_v49 = vand.u32 2147483648, %v2910_v21 }
 0x357   : > { %v1461_v3 = vadd.f32 %v2930_v17, %v1460_v8  ;;  %v1469_v19 = vor.u32 1.1754944e-38, %v1468_v10 }
 0x358   : > { %v305_v30 = vadd.f32 %v304_v26, %v303_v22  ;;  %v1549_v32 = vor.u32 1.1754944e-38, %v1548_v49 }
 0x359   : > { %v1465_v21 = vsel %vm1464_vm8, %v2930_v17, %v1461_v3 }
 0x35a   : > { %306 = vadd.xlane.f32.xlu0 %v305_v30  ;;  %v1550_v43 = vsel %vm1547_vm2, %v1549_v32, %v1545_v24 }
 0x3b5   : > { %v1360_v42 = vpop.f32.mrf.mxu2 }
 0x3b6   : > { %v1392_v40 = vsub.f32 %v1360_v42, %v2787_v11  ;;  %v1425_v11 = vsel %vm1422_vm3, %v1424_v48, %v1420_v47 }
 0x3b8   : > { %v1396_v46 = vmul.f32 2.0, %v1392_v40 }
 0x3ba   : > { %v1400_v54 = vadd.f32 0.0009, %v1396_v46  ;;  %v1483_v46 = vadd.f32 0.0001, %v1479_v27 }
 0x3bc   : > { %v1426_v34 = vmul.f32 %v1425_v11, %v1400_v54  ;;  %v1551_v28 = vmul.f32 %v1550_v43, %v1483_v46 }
 0x3bd   : > { %v1363_v51 = vpop.f32.mrf.mxu2 }
 0x3be   : > { %v1552_v57 = vmul.f32 %v2801_v15, %v1426_v34  ;;  %v1393_v45 = vsub.f32 %v1363_v51, %v2795_v62  ;;  %v1446_v62 = vadd.f32 %v2918_v13, %v1445_v18 }
 0x3c0   : > { %v1397_v56 = vmul.f32 2.0, %v1393_v45  ;;  %v1450_v7 = vsel %vm1449_vm11, %v2918_v13, %v1446_v62  ;;  %v1466_v13 = vand.u32 2147483647, %v2913_v29 }
 0x3c2   : > { %v1401_v50 = vadd.f32 0.0009, %v1397_v56  ;;  %vm1467_vm3 = vcmp.eq.f32.partialorder %v1466_v13, 8.507059e+37 }
 0x3c3   : > { %v1470_v6 = vsel %vm1467_vm3, %v1469_v19, %v1465_v21 }
 0x3c4   : > { %v1441_v15 = vmul.f32 %v1440_v41, %v1401_v50 }
 0x3c5   : > { %v1366_v23 = vpop.f32.mrf.mxu2 }
 0x3c6   : > { %v1553_v16 = vmul.f32 %v2803_v44, %v1441_v15  ;;  %v1394_v31 = vsub.f32 %v1366_v23, %v2777_v35  ;;  %v1455_v35 = vsel %vm1452_vm13, %v1454_v12, %v1450_v7 }
 0x3c8   : > { %v1398_v52 = vmul.f32 2.0, %v1394_v31  ;;  %v1556_v5 = vadd.f32 %v1553_v16, %v1552_v57 }
 0x3ca   : > { %v1402_v44 = vadd.f32 0.0009, %v1398_v52 }
 0x3cc   : > { %v1456_v22 = vmul.f32 %v1455_v35, %v1402_v44 }
 0x3cd   : > { %v1369_v30 = vpop.f32.mrf.mxu2 }
 0x3ce   : > { %v1395_v14 = vsub.f32 %v1369_v30, %v1391_v61  ;;  %v1554_v42 = vmul.f32 %v2799_v53, %v1456_v22  ;;  %v307_v53 = vpop.xlane.xlu0 %306 }
 0x3cf   : > { %v308_v29 = vrot.slane %v307_v53, 4 }
 0x3d0   : > { %v1399_v40 = vmul.f32 2.0, %v1395_v14  ;;  %v1557_v37 = vadd.f32 %v1556_v5, %v1554_v42 }
 0x3d1   : > { %v309_v34 = vadd.f32 %v308_v29, %v307_v53 }
 0x3d2   : > { %v1403_v47 = vadd.f32 0.0009, %v1399_v40 }
 0x3d3   : > { %v310_v36 = vrot.slane %v309_v34, 2 }
 0x3d4   : > { %v1471_v48 = vmul.f32 %v1470_v6, %v1403_v47 }
 0x3d5   : > { %v311_v9 = vadd.f32 %v310_v36, %v309_v34 }
 0x3d6   : > { %v1555_v54 = vmul.f32 %v1551_v28, %v1471_v48 }
 0x3d7   : > { %v312_v17 = vrot.slane %v311_v9, 1 }
 0x3d8   : > { %v1558_v11 = vadd.f32 %v1557_v37, %v1555_v54 }
 0x3d9   : > { %v313_v39 = vadd.f32 %v312_v17, %v311_v9 }
 0x3da   : > { %1559 = vadd.xlane.f32.xlu0 %v1558_v11 }
 0x3db   : > { %1797 = vpush %v313_v39 }
 0x40c   : > { %s1798_s30 = spop %1797 }
 0x40d   : > { %v1568_v20 = vstv %s1798_s30 }
 0x40e   : > { %1570 = vst [vmem:[%s238_s23] sm:$0xff] %v1568_v20 }
 0x44d   : > { %v1560_v51 = vpop.xlane.xlu0 %1559 }
 0x44e   : > { %v1561_v63 = vrot.slane %v1560_v51, 4 }
 0x450   : > { %v1562_v57 = vadd.f32 %v1561_v63, %v1560_v51 }
 0x452   : > { %v1563_v45 = vrot.slane %v1562_v57, 2 }
 0x454   : > { %v1564_v33 = vadd.f32 %v1563_v45, %v1562_v57 }
 0x456   : > { %v1565_v59 = vrot.slane %v1564_v33, 1 }
 0x458   : > { %v1566_v56 = vadd.f32 %v1565_v59, %v1564_v33 }
 0x45a   : > { %1799 = vpush %v1566_v56 }
 0x45b   : > { %2066 = shalt.err (!%p2063_p3)
}
 0x45c   : > { %1801 = dma.vmem_to_hbm [thread:$0]  (%p2200_p5), %s1593_s25, 128, %s1595_s26, %s1575_s6  }
 0x45d   : > { %s1604_s23 = scalar_lea.hbm %s3031_s5, %s2216_s9  ;;  %s245_s30 = scalar_lea.vmem [#allocation4], %s1717_s15 }
 0x45e   : > { %s1606_s10 = sshll.u32 %s245_s30, 4  ;;  %s1608_s11 = sshll.u32 %s1604_s23, 4  ;;  %s1607_s10 = int_to_ptr.vmem [resolvable:$true] %s1606_s10  ;;  %s1609_s11 = int_to_ptr.hbm [resolvable:$true] %s1608_s11 }
 0x45f   : > { %s1580_s7 = scalar_lea.sflag [#allocation5], %s2976_s14  ;;  %s2081_s8 = sshra.s32 %s1609_s11, 4  ;;  %s2082_s8 = int_to_ptr.hbm [resolvable:$true] %s2081_s8 }
 0x460   : > { %s2083_s12 = scalar_lea.hbm %s2082_s8, 8  ;;  %s2087_s9 = scalar_lea.hbm %s3031_s5, 16 }
 0x461   : > { %p2084_p4 = scmp.ne.s32.totalorder %s2082_s8, %s2083_s12  ;;  %p2088_p9 = scmp.lt.s32.totalorder %s2082_s8, %s3031_s5 }
 0x462   : > { %p2089_p10 = scmp.lt.s32.totalorder %s2087_s9, %s2083_s12 }
 0x463   : > { %p2085_p7 = pnand %p2084_p4, %p2200_p5 }
 0x464   : > { %p2090_p11 = por %p2089_p10, %p2088_p9 }
 0x465   : > { %p2086_p8 = pneg %p2085_p7 }
 0x467   : > { %p2091_p12 = pnand %p2090_p11, %p2086_p8 }
 0x48b   : > { %s1800_s13 = spop %1799 }
 0x48c   : > { %v1571_v18 = vstv %s1800_s13 }
 0x48d   : > { %1573 = vst [vmem:[%s245_s30] sm:$0xff] %v1571_v18 }
 0x48e   : > { %2094 = shalt.err (!%p2091_p12)
}
 0x48f   : > { %1802 = dma.vmem_to_hbm [thread:$0]  (%p2200_p5), %s1607_s10, 128, %s1609_s11, %s1580_s7  }
 0x490 PF: > { %p1812_p13 = scmp.ge.s32.totalorder %s2133_s21, 2  ;;  %s1620_s14 = sand.u32 1, %s2121_s18  }
 0x491   : > { %s1621_s16 = scalar_lea.sflag [#allocation3], %s1620_s14 }
 0x492   : > { %p1806_p0 = pnand %p1812_p13, %p2204_p6 }
 0x494   : > { %p1807_p1 = pneg %p1806_p0 }
 0x496   : > { %2112 = dma.done.wait (%p1807_p1), %s1621_s16, 128  }
 0x497   : > { %2114 = vsyncadd (%p1807_p1), %s1621_s16, 4294967168  ;;  %s1631_s17 = scalar_lea.sflag [#allocation5], %s1620_s14 }
 0x498   : > { %2116 = dma.done.wait (%p1807_p1), %s1631_s17, 128  }
 0x499   : > { %2118 = vsyncadd (%p1807_p1), %s1631_s17, 4294967168  ;;  %p19_p5 = scmp.ge.s32.totalorder %s2188_s24, 4   ;;  %s3092_s18 = smov %s2125_s19 }
 0x49a   : > { %s3093_s19 = smov %s2129_s20  ;;  %s3094_s20 = smov %s2198_s27 }
 0x49b   : > { %s3095_s21 = smov %s2188_s24  ;;  %21 = sbr.rel (!%p19_p5) target bundleno = 5 (0x5), region = 91 }
 0x4a0   :  { %1637 = vsyncpa [#allocation3], 1 }
 0x4a1   :  { %1639 = vsyncpa [#allocation3 + $0x1], 1 }
 0x4a2   :  { %1640 = vsyncpa [#allocation5], 1 }
 0x4a3   :  { %1642 = vsyncpa [#allocation5 + $0x1], 1 }

</bundles_post_ra>
